<compile_context>
chip_gen: v7x
topology: tpu7x:2x2x1
jax: 0.10.0
libtpu: 0.0.40
codegen_flags: <defaults>
</compile_context>

<pallas_src>
import math
import functools

import jax
import jax.numpy as jnp
from jax.experimental import pallas as pl
from jax.experimental.pallas import tpu as pltpu


LANE = 128      # TPU vreg lane width
SUBLANE = 8     # TPU vreg sublane count


def _round_up(x, m):
    return ((x + m - 1) // m) * m


# --------------------------------------------------------------------------
# Fused kernel over one [tile_l, *] sequence tile of one batch element:
#   input_up_proj (Linear -> Tanh -> Linear, 2nd bias pre-folded into emb)
#   + position embedding + per-batch time embedding
#   LayerNorm          (nn.Dropout in eval mode == identity)
#   output_down_proj (Linear -> Tanh -> Linear)
# --------------------------------------------------------------------------
def godcaster_kernel(x_ref, pos_ref, emb_ref,
                     wu1_ref, bu1_ref, wu2_ref,
                     ln_g_ref, ln_b_ref,
                     wd1_ref, bd1_ref, wd2_ref, bd2_ref,
                     out_ref, *, eps, true_h):
    cdt = wu1_ref.dtype                                   # matmul operand dtype

    # ---- input_up_proj: Linear -> Tanh -> Linear (bias #2 folded into emb) --
    h1 = jnp.dot(x_ref[...], wu1_ref[...],
                 preferred_element_type=jnp.float32) + bu1_ref[...]
    h1 = jnp.tanh(h1).astype(cdt)                         # cast at production
    emb_x = jnp.dot(h1, wu2_ref[...], preferred_element_type=jnp.float32)

    # ---- + position embedding + (time emb + bu2) row for this batch --------
    ei = emb_x + pos_ref[...] + emb_ref[...]              # padded lanes stay 0

    # ---- LayerNorm over the true (unpadded) hidden width --------------------
    hp = ei.shape[-1]
    inv_h = 1.0 / true_h
    mu = jnp.sum(ei, axis=-1, keepdims=True) * inv_h      # padded lanes are 0
    xc = ei - mu                                          # computed once, reused
    var = jnp.sum(xc * xc, axis=-1, keepdims=True)
    if hp != true_h:                                      # drop padded-lane term
        var = var - (hp - true_h) * (mu * mu)
    var = var * inv_h
    ln = xc * jax.lax.rsqrt(var + eps) * ln_g_ref[...] + ln_b_ref[...]
    # nn.Dropout in eval mode is the identity.
    # TODO(synk): GodCasterEncoder (self.input_transformers over video/text) has
    # no definition in the provided source; treated as identity.
    hid = ln.astype(cdt)

    # ---- output_down_proj: Linear -> Tanh -> Linear -------------------------
    d1 = jnp.tanh(jnp.dot(hid, wd1_ref[...],
                          preferred_element_type=jnp.float32) + bd1_ref[...])
    d1 = d1.astype(cdt)
    out = jnp.dot(d1, wd2_ref[...], preferred_element_type=jnp.float32) + bd2_ref[...]
    out_ref[...] = out.astype(out_ref.dtype)


# --------------------------------------------------------------------------
# Sinusoidal timestep embedding (tiny, stays in plain JAX)
# --------------------------------------------------------------------------
def timestep_embedding(timesteps, dim, max_period=10000):
    half = dim // 2
    freqs = jnp.exp(-math.log(max_period) *
                    jnp.arange(half, dtype=jnp.float32) / half)
    args = timesteps[:, None].astype(jnp.float32) * freqs[None]
    emb = jnp.concatenate([jnp.cos(args), jnp.sin(args)], axis=-1)
    if dim % 2:
        emb = jnp.concatenate([emb, jnp.zeros_like(emb[:, :1])], axis=-1)
    return emb


# --------------------------------------------------------------------------
# Wrapper: hoists time_embed, folds constants, pads to lane-dense shapes,
# tiles over (seq, batch) and calls the fused kernel.
# --------------------------------------------------------------------------
def godcaster_forward(params, x, video, text, timesteps, *,
                      max_tile_l=256,          # raise to 512-1024 on v6e; <=256 on v7x
                      eps=1e-12,               # config.layer_norm_eps (torch default 1e-5)
                      matmul_dtype=jnp.bfloat16):   # set jnp.float32 for exact f32 path
    # video / text would feed GodCasterEncoder; unused by the identity placeholder.
    del video, text
    N, L, C_in = x.shape
    mc = params["wt1"].shape[0]
    H = params["wu2"].shape[1]
    C_out = params["wd2"].shape[1]

    # ---- padded (lane / sublane dense) extents ----
    Hp = _round_up(H, LANE)
    Cp = _round_up(C_in, LANE)
    Cop = _round_up(C_out, LANE)

    # ---- adaptive row tile over the sequence dim ----
    tile_l = min(max_tile_l, _round_up(L, SUBLANE))
    if Hp >= 2048:                       # keep f32 [tile_l, Hp] intermediates small
        tile_l = min(tile_l, 128)
    Lp = _round_up(L, tile_l)
    n_l = Lp // tile_l

    # ---- time_embed MLP on host (tiny [N, mc] matmuls) ----
    ts_emb = timestep_embedding(timesteps, mc)                       # [N, mc]
    t1 = ts_emb @ params["wt1"] + params["bt1"]
    t1 = t1 * jax.nn.sigmoid(t1)                                     # SiLU
    emb = t1 @ params["wt2"] + params["bt2"]                         # [N, H]
    # (num_classes is None in this config, so no label_emb term.)

    # fold input_up_proj second bias into the per-batch additive row
    emb_add = emb + params["bu2"]                                    # [N, H]
    emb_add = jnp.pad(emb_add, ((0, 0), (0, Hp - H))).astype(jnp.float32)
    emb_add = emb_add.reshape(N, 1, Hp)                              # [N, 1, Hp]

    pos = jnp.pad(params["pos_emb"][:L],
                  ((0, Lp - L), (0, Hp - H))).astype(jnp.float32)    # [Lp, Hp]

    # ---- zero-padded weights (padding keeps padded lanes exactly zero) ----
    wu1 = jnp.pad(params["wu1"], ((0, Cp - C_in), (0, Hp - H))).astype(matmul_dtype)
    wu2 = jnp.pad(params["wu2"], ((0, Hp - H), (0, Hp - H))).astype(matmul_dtype)
    wd1 = jnp.pad(params["wd1"], ((0, Hp - H), (0, Hp - H))).astype(matmul_dtype)
    wd2 = jnp.pad(params["wd2"], ((0, Hp - H), (0, Cop - C_out))).astype(matmul_dtype)
    bu1 = jnp.pad(params["bu1"], ((0, 0), (0, Hp - H))).astype(jnp.float32)
    bd1 = jnp.pad(params["bd1"], ((0, 0), (0, Hp - H))).astype(jnp.float32)
    bd2 = jnp.pad(params["bd2"], ((0, 0), (0, Cop - C_out))).astype(jnp.float32)
    ln_g = jnp.pad(params["ln_g"], ((0, 0), (0, Hp - H))).astype(jnp.float32)
    ln_b = jnp.pad(params["ln_b"], ((0, 0), (0, Hp - H))).astype(jnp.float32)

    xp = jnp.pad(x, ((0, 0), (0, Lp - L), (0, Cp - C_in))).astype(matmul_dtype)

    # ---- explicit VMEM budget: single-buffered weights + double-buffered streams
    wdt = jnp.dtype(matmul_dtype).itemsize
    odt = jnp.dtype(x.dtype).itemsize
    weight_bytes = (Cp * Hp + 2 * Hp * Hp + Hp * Cop) * wdt
    const_bytes = (4 * Hp + Cop) * 4
    stream_bytes = 2 * (tile_l * (Cp * wdt + Hp * 4 + Cop * odt) + Hp * 4)
    work_bytes = 8 * tile_l * Hp * 4                     # f32 intermediates estimate
    vmem_limit = int(min(max(1.25 * (weight_bytes + const_bytes +
                                     stream_bytes + work_bytes), 4 << 20), 64 << 20))

    kernel = functools.partial(godcaster_kernel, eps=eps, true_h=H)
    grid = (n_l, N)       # batch innermost: pos block stays resident across it
    flops = 2 * N * Lp * (Cp * Hp + 2 * Hp * Hp + Hp * Cop)
    bytes_accessed = int(xp.size * wdt + pos.size * 4 + emb_add.size * 4 +
                         weight_bytes + const_bytes + N * Lp * Cop * odt)

    def run(single_buffer):
        def const(shape):
            idx = lambda l, b, _n=len(shape): (0,) * _n
            if single_buffer:
                # grid-invariant operand: resident once, no double-buffering
                return pl.BlockSpec(shape, idx, pipeline_mode=pl.Buffered(1))
            return pl.BlockSpec(shape, idx)

        in_specs = [
            pl.BlockSpec((None, tile_l, Cp), lambda l, b: (b, l, 0)),   # x rows
            pl.BlockSpec((tile_l, Hp), lambda l, b: (l, 0)),            # pos emb tile
            pl.BlockSpec((None, 1, Hp), lambda l, b: (b, 0, 0)),        # time emb + bu2
            const((Cp, Hp)), const((1, Hp)),                            # input_up_proj.0
            const((Hp, Hp)),                                            # input_up_proj.2
            const((1, Hp)), const((1, Hp)),                             # LayerNorm g / b
            const((Hp, Hp)), const((1, Hp)),                            # output_down_proj.0
            const((Hp, Cop)), const((1, Cop)),                          # output_down_proj.2
        ]
        return pl.pallas_call(
            kernel,
            out_shape=jax.ShapeDtypeStruct((N, Lp, Cop), x.dtype),
            grid=grid,
            in_specs=in_specs,
            out_specs=pl.BlockSpec((None, tile_l, Cop), lambda l, b: (b, l, 0)),
            compiler_params=pltpu.CompilerParams(
                dimension_semantics=("parallel", "parallel"),   # megacore sharding
                vmem_limit_bytes=vmem_limit),
            cost_estimate=pl.CostEstimate(
                flops=flops,
                transcendentals=2 * N * Lp * Hp + N * Lp,
                bytes_accessed=bytes_accessed),
        )(xp, pos, emb_add, wu1, bu1, wu2, ln_g, ln_b, wd1, bd1, wd2, bd2)

    try:
        out = run(single_buffer=True)
    except Exception:
        # pipeline_mode=pl.Buffered(1) not honored on this jax/libtpu build;
        # fall back to default (double-buffered) constants.
        out = run(single_buffer=False)

    # Strip row / lane padding; PyTorch casts back to x.dtype (already is).
    return out[:, :L, :C_out]


# --------------------------------------------------------------------------
# Deterministic parameter initialization (shapes follow GodCaster.__init__)
# --------------------------------------------------------------------------
def init_params(key, C_in, mc, H, C_out, max_pos):
    tdim = 4 * mc
    ks = jax.random.split(key, 8)

    def lin(k, i, o):
        return jax.random.normal(k, (i, o), jnp.float32) * 0.02

    return dict(
        # time_embed: Linear(mc, 4mc) -> SiLU -> Linear(4mc, H)
        wt1=lin(ks[0], mc, tdim), bt1=jnp.zeros((1, tdim), jnp.float32),
        wt2=lin(ks[1], tdim, H),  bt2=jnp.zeros((1, H), jnp.float32),
        # input_up_proj: Linear(C_in, H) -> Tanh -> Linear(H, H)
        wu1=lin(ks[2], C_in, H),  bu1=jnp.zeros((1, H), jnp.float32),
        wu2=lin(ks[3], H, H),     bu2=jnp.zeros((1, H), jnp.float32),
        # LayerNorm(H)  (eps from config.layer_norm_eps; see godcaster_forward)
        ln_g=jnp.ones((1, H), jnp.float32), ln_b=jnp.zeros((1, H), jnp.float32),
        # output_down_proj: Linear(H, H) -> Tanh -> Linear(H, C_out)
        wd1=lin(ks[4], H, H),     bd1=jnp.zeros((1, H), jnp.float32),
        wd2=lin(ks[5], H, C_out), bd2=jnp.zeros((1, C_out), jnp.float32),
        # position_embeddings
        pos_emb=lin(ks[6], max_pos, H),
        # word_embedding / lm_head are unused by forward(); omitted.
    )


if __name__ == "__main__":
    key = jax.random.PRNGKey(0)
    N, L, C_in = 2, 8, 16          # batch, seq, in_channels
    mc, H, C_out = 8, 32, 16       # model_channels, hidden_size, out_channels
    max_pos = 64

    kp, kx, kv, kt = jax.random.split(key, 4)
    params = init_params(kp, C_in, mc, H, C_out, max_pos)

    x = jax.random.normal(kx, (N, L, C_in), jnp.float32)
    video = jax.random.normal(kv, (N, 4, H), jnp.float32)   # encoder input (unused placeholder)
    text = jax.random.normal(kt, (N, 6, H), jnp.float32)    # encoder input (unused placeholder)
    timesteps = jnp.array([0.0, 10.0], dtype=jnp.float32)

    out = godcaster_forward(params, x, video, text, timesteps)
    out = jax.block_until_ready(out)
    assert out.shape == (N, L, C_out) and out.dtype == x.dtype
    print("KERNEL_OK")
</pallas_src>

<mosaic_0001>
module attributes {stable_mosaic.version = 11 : i64} {
  func.func @godcaster_kernel(%arg0: i32, %arg1: i32, %arg2: memref<1x8x128xbf16, #tpu.memory_space<vmem>>, %arg3: memref<8x128xf32, #tpu.memory_space<vmem>>, %arg4: memref<1x1x128xf32, #tpu.memory_space<vmem>>, %arg5: memref<128x128xbf16, #tpu.memory_space<vmem>>, %arg6: memref<1x128xf32, #tpu.memory_space<vmem>>, %arg7: memref<128x128xbf16, #tpu.memory_space<vmem>>, %arg8: memref<1x128xf32, #tpu.memory_space<vmem>>, %arg9: memref<1x128xf32, #tpu.memory_space<vmem>>, %arg10: memref<128x128xbf16, #tpu.memory_space<vmem>>, %arg11: memref<1x128xf32, #tpu.memory_space<vmem>>, %arg12: memref<128x128xbf16, #tpu.memory_space<vmem>>, %arg13: memref<1x128xf32, #tpu.memory_space<vmem>>, %arg14: memref<1x8x128xf32, #tpu.memory_space<vmem>>) attributes {dimension_semantics = [#tpu.dimension_semantics<parallel>, #tpu.dimension_semantics<parallel>], iteration_bounds = array<i64: 1, 2>, scalar_prefetch = 0 : i64, scratch_operands = 0 : i64, tpu.core_type = #tpu.core_type<tc>, window_params = [{transform_indices = @transform_0, window_bounds = array<i64: 1, 8, 128>}, {transform_indices = @transform_1, window_bounds = array<i64: 8, 128>}, {transform_indices = @transform_2, window_bounds = array<i64: 1, 1, 128>}, {pipeline_mode = #tpu.pipeline_mode<synchronous>, transform_indices = @transform_3, window_bounds = array<i64: 128, 128>}, {pipeline_mode = #tpu.pipeline_mode<synchronous>, transform_indices = @transform_4, window_bounds = array<i64: 1, 128>}, {pipeline_mode = #tpu.pipeline_mode<synchronous>, transform_indices = @transform_5, window_bounds = array<i64: 128, 128>}, {pipeline_mode = #tpu.pipeline_mode<synchronous>, transform_indices = @transform_6, window_bounds = array<i64: 1, 128>}, {pipeline_mode = #tpu.pipeline_mode<synchronous>, transform_indices = @transform_7, window_bounds = array<i64: 1, 128>}, {pipeline_mode = #tpu.pipeline_mode<synchronous>, transform_indices = @transform_8, window_bounds = array<i64: 128, 128>}, {pipeline_mode = #tpu.pipeline_mode<synchronous>, transform_indices = @transform_9, window_bounds = array<i64: 1, 128>}, {pipeline_mode = #tpu.pipeline_mode<synchronous>, transform_indices = @transform_10, window_bounds = array<i64: 128, 128>}, {pipeline_mode = #tpu.pipeline_mode<synchronous>, transform_indices = @transform_11, window_bounds = array<i64: 1, 128>}, {transform_indices = @transform_12, window_bounds = array<i64: 1, 8, 128>}]} {
    %c0 = arith.constant 0 : index
    %c0_0 = arith.constant 0 : index
    %c0_1 = arith.constant 0 : index
    %0 = vector.load %arg2[%c0, %c0_0, %c0_1] : memref<1x8x128xbf16, #tpu.memory_space<vmem>>, vector<1x8x128xbf16>
    %1 = vector.shape_cast %0 : vector<1x8x128xbf16> to vector<8x128xbf16>
    %c0_2 = arith.constant 0 : index
    %c0_3 = arith.constant 0 : index
    %2 = vector.load %arg5[%c0_2, %c0_3] : memref<128x128xbf16, #tpu.memory_space<vmem>>, vector<128x128xbf16>
    %cst = arith.constant dense<0.000000e+00> : vector<8x128xf32>
    %3 = tpu.matmul %1, %2, %cst {dimension_numbers = #tpu.dot_dimension_numbers<[1], [0], [0], [1], [0, 0, 1, 1], [], []>} : vector<8x128xbf16>, vector<128x128xbf16>, vector<8x128xf32> -> vector<8x128xf32>
    %c0_4 = arith.constant 0 : index
    %c0_5 = arith.constant 0 : index
    %4 = vector.load %arg6[%c0_4, %c0_5] : memref<1x128xf32, #tpu.memory_space<vmem>>, vector<1x128xf32>
    %5 = vector.broadcast %4 : vector<1x128xf32> to vector<8x128xf32>
    %6 = arith.addf %3, %5 : vector<8x128xf32>
    %7 = math.tanh %6 : vector<8x128xf32>
    %8 = arith.truncf %7 : vector<8x128xf32> to vector<8x128xbf16>
    %c0_6 = arith.constant 0 : index
    %c0_7 = arith.constant 0 : index
    %9 = vector.load %arg7[%c0_6, %c0_7] : memref<128x128xbf16, #tpu.memory_space<vmem>>, vector<128x128xbf16>
    %cst_8 = arith.constant dense<0.000000e+00> : vector<8x128xf32>
    %10 = tpu.matmul %8, %9, %cst_8 {dimension_numbers = #tpu.dot_dimension_numbers<[1], [0], [0], [1], [0, 0, 1, 1], [], []>} : vector<8x128xbf16>, vector<128x128xbf16>, vector<8x128xf32> -> vector<8x128xf32>
    %c0_9 = arith.constant 0 : index
    %c0_10 = arith.constant 0 : index
    %11 = vector.load %arg3[%c0_9, %c0_10] : memref<8x128xf32, #tpu.memory_space<vmem>>, vector<8x128xf32>
    %12 = arith.addf %10, %11 : vector<8x128xf32>
    %c0_11 = arith.constant 0 : index
    %c0_12 = arith.constant 0 : index
    %c0_13 = arith.constant 0 : index
    %13 = vector.load %arg4[%c0_11, %c0_12, %c0_13] : memref<1x1x128xf32, #tpu.memory_space<vmem>>, vector<1x1x128xf32>
    %14 = vector.shape_cast %13 : vector<1x1x128xf32> to vector<1x128xf32>
    %15 = vector.broadcast %14 : vector<1x128xf32> to vector<8x128xf32>
    %16 = arith.addf %12, %15 : vector<8x128xf32>
    %cst_14 = arith.constant dense<0.000000e+00> : vector<8xf32>
    %17 = vector.multi_reduction <add>, %16, %cst_14 [1] : vector<8x128xf32> to vector<8xf32>
    %18 = vector.shape_cast %17 : vector<8xf32> to vector<8x1xf32>
    %cst_15 = arith.constant 3.125000e-02 : f32
    %19 = vector.broadcast %cst_15 : f32 to vector<8x1xf32>
    %20 = arith.mulf %18, %19 : vector<8x1xf32>
    %21 = vector.broadcast %20 : vector<8x1xf32> to vector<8x128xf32>
    %22 = arith.subf %16, %21 : vector<8x128xf32>
    %23 = arith.mulf %22, %22 : vector<8x128xf32>
    %cst_16 = arith.constant dense<0.000000e+00> : vector<8xf32>
    %24 = vector.multi_reduction <add>, %23, %cst_16 [1] : vector<8x128xf32> to vector<8xf32>
    %25 = vector.shape_cast %24 : vector<8xf32> to vector<8x1xf32>
    %26 = arith.mulf %20, %20 : vector<8x1xf32>
    %cst_17 = arith.constant 9.600000e+01 : f32
    %27 = vector.broadcast %cst_17 : f32 to vector<8x1xf32>
    %28 = arith.mulf %27, %26 : vector<8x1xf32>
    %29 = arith.subf %25, %28 : vector<8x1xf32>
    %cst_18 = arith.constant 3.125000e-02 : f32
    %30 = vector.broadcast %cst_18 : f32 to vector<8x1xf32>
    %31 = arith.mulf %29, %30 : vector<8x1xf32>
    %cst_19 = arith.constant 9.99999996E-13 : f32
    %32 = vector.broadcast %cst_19 : f32 to vector<8x1xf32>
    %33 = arith.addf %31, %32 : vector<8x1xf32>
    %34 = math.rsqrt %33 : vector<8x1xf32>
    %35 = vector.broadcast %34 : vector<8x1xf32> to vector<8x128xf32>
    %36 = arith.mulf %22, %35 : vector<8x128xf32>
    %c0_20 = arith.constant 0 : index
    %c0_21 = arith.constant 0 : index
    %37 = vector.load %arg8[%c0_20, %c0_21] : memref<1x128xf32, #tpu.memory_space<vmem>>, vector<1x128xf32>
    %38 = vector.broadcast %37 : vector<1x128xf32> to vector<8x128xf32>
    %39 = arith.mulf %36, %38 : vector<8x128xf32>
    %c0_22 = arith.constant 0 : index
    %c0_23 = arith.constant 0 : index
    %40 = vector.load %arg9[%c0_22, %c0_23] : memref<1x128xf32, #tpu.memory_space<vmem>>, vector<1x128xf32>
    %41 = vector.broadcast %40 : vector<1x128xf32> to vector<8x128xf32>
    %42 = arith.addf %39, %41 : vector<8x128xf32>
    %43 = arith.truncf %42 : vector<8x128xf32> to vector<8x128xbf16>
    %c0_24 = arith.constant 0 : index
    %c0_25 = arith.constant 0 : index
    %44 = vector.load %arg10[%c0_24, %c0_25] : memref<128x128xbf16, #tpu.memory_space<vmem>>, vector<128x128xbf16>
    %cst_26 = arith.constant dense<0.000000e+00> : vector<8x128xf32>
    %45 = tpu.matmul %43, %44, %cst_26 {dimension_numbers = #tpu.dot_dimension_numbers<[1], [0], [0], [1], [0, 0, 1, 1], [], []>} : vector<8x128xbf16>, vector<128x128xbf16>, vector<8x128xf32> -> vector<8x128xf32>
    %c0_27 = arith.constant 0 : index
    %c0_28 = arith.constant 0 : index
    %46 = vector.load %arg11[%c0_27, %c0_28] : memref<1x128xf32, #tpu.memory_space<vmem>>, vector<1x128xf32>
    %47 = vector.broadcast %46 : vector<1x128xf32> to vector<8x128xf32>
    %48 = arith.addf %45, %47 : vector<8x128xf32>
    %49 = math.tanh %48 : vector<8x128xf32>
    %50 = arith.truncf %49 : vector<8x128xf32> to vector<8x128xbf16>
    %c0_29 = arith.constant 0 : index
    %c0_30 = arith.constant 0 : index
    %51 = vector.load %arg12[%c0_29, %c0_30] : memref<128x128xbf16, #tpu.memory_space<vmem>>, vector<128x128xbf16>
    %cst_31 = arith.constant dense<0.000000e+00> : vector<8x128xf32>
    %52 = tpu.matmul %50, %51, %cst_31 {dimension_numbers = #tpu.dot_dimension_numbers<[1], [0], [0], [1], [0, 0, 1, 1], [], []>} : vector<8x128xbf16>, vector<128x128xbf16>, vector<8x128xf32> -> vector<8x128xf32>
    %c0_32 = arith.constant 0 : index
    %c0_33 = arith.constant 0 : index
    %53 = vector.load %arg13[%c0_32, %c0_33] : memref<1x128xf32, #tpu.memory_space<vmem>>, vector<1x128xf32>
    %54 = vector.broadcast %53 : vector<1x128xf32> to vector<8x128xf32>
    %55 = arith.addf %52, %54 : vector<8x128xf32>
    %c0_34 = arith.constant 0 : index
    %c0_35 = arith.constant 0 : index
    %c0_36 = arith.constant 0 : index
    %56 = vector.load %arg14[%c0_34, %c0_35, %c0_36] : memref<1x8x128xf32, #tpu.memory_space<vmem>>, vector<1x8x128xf32>
    %57 = vector.shape_cast %56 : vector<1x8x128xf32> to vector<8x128xf32>
    %58 = vector.shape_cast %55 : vector<8x128xf32> to vector<1x8x128xf32>
    tpu.vector_store %arg14[%c0_34, %c0_35, %c0_36], %58 {strides = array<i32>} : memref<1x8x128xf32, #tpu.memory_space<vmem>>, vector<1x8x128xf32>,
    return
  }
  func.func @transform_0(%arg0: i32, %arg1: i32) -> (i32, i32, i32) {
    %c0_i32 = arith.constant 0 : i32
    %c0_i32_0 = arith.constant 0 : i32
    return %arg1, %arg0, %c0_i32 : i32, i32, i32
  }
  func.func @transform_1(%arg0: i32, %arg1: i32) -> (i32, i32) {
    %c0_i32 = arith.constant 0 : i32
    %c0_i32_0 = arith.constant 0 : i32
    return %arg0, %c0_i32 : i32, i32
  }
  func.func @transform_2(%arg0: i32, %arg1: i32) -> (i32, i32, i32) {
    %c0_i32 = arith.constant 0 : i32
    %c0_i32_0 = arith.constant 0 : i32
    %c0_i32_1 = arith.constant 0 : i32
    return %arg1, %c0_i32, %c0_i32_0 : i32, i32, i32
  }
  func.func @transform_3(%arg0: i32, %arg1: i32) -> (i32, i32) {
    %c0_i32 = arith.constant 0 : i32
    %c0_i32_0 = arith.constant 0 : i32
    %c0_i32_1 = arith.constant 0 : i32
    return %c0_i32, %c0_i32_0 : i32, i32
  }
  func.func @transform_4(%arg0: i32, %arg1: i32) -> (i32, i32) {
    %c0_i32 = arith.constant 0 : i32
    %c0_i32_0 = arith.constant 0 : i32
    %c0_i32_1 = arith.constant 0 : i32
    return %c0_i32, %c0_i32_0 : i32, i32
  }
  func.func @transform_5(%arg0: i32, %arg1: i32) -> (i32, i32) {
    %c0_i32 = arith.constant 0 : i32
    %c0_i32_0 = arith.constant 0 : i32
    %c0_i32_1 = arith.constant 0 : i32
    return %c0_i32, %c0_i32_0 : i32, i32
  }
  func.func @transform_6(%arg0: i32, %arg1: i32) -> (i32, i32) {
    %c0_i32 = arith.constant 0 : i32
    %c0_i32_0 = arith.constant 0 : i32
    %c0_i32_1 = arith.constant 0 : i32
    return %c0_i32, %c0_i32_0 : i32, i32
  }
  func.func @transform_7(%arg0: i32, %arg1: i32) -> (i32, i32) {
    %c0_i32 = arith.constant 0 : i32
    %c0_i32_0 = arith.constant 0 : i32
    %c0_i32_1 = arith.constant 0 : i32
    return %c0_i32, %c0_i32_0 : i32, i32
  }
  func.func @transform_8(%arg0: i32, %arg1: i32) -> (i32, i32) {
    %c0_i32 = arith.constant 0 : i32
    %c0_i32_0 = arith.constant 0 : i32
    %c0_i32_1 = arith.constant 0 : i32
    return %c0_i32, %c0_i32_0 : i32, i32
  }
  func.func @transform_9(%arg0: i32, %arg1: i32) -> (i32, i32) {
    %c0_i32 = arith.constant 0 : i32
    %c0_i32_0 = arith.constant 0 : i32
    %c0_i32_1 = arith.constant 0 : i32
    return %c0_i32, %c0_i32_0 : i32, i32
  }
  func.func @transform_10(%arg0: i32, %arg1: i32) -> (i32, i32) {
    %c0_i32 = arith.constant 0 : i32
    %c0_i32_0 = arith.constant 0 : i32
    %c0_i32_1 = arith.constant 0 : i32
    return %c0_i32, %c0_i32_0 : i32, i32
  }
  func.func @transform_11(%arg0: i32, %arg1: i32) -> (i32, i32) {
    %c0_i32 = arith.constant 0 : i32
    %c0_i32_0 = arith.constant 0 : i32
    %c0_i32_1 = arith.constant 0 : i32
    return %c0_i32, %c0_i32_0 : i32, i32
  }
  func.func @transform_12(%arg0: i32, %arg1: i32) -> (i32, i32, i32) {
    %c0_i32 = arith.constant 0 : i32
    %c0_i32_0 = arith.constant 0 : i32
    return %arg1, %arg0, %c0_i32 : i32, i32, i32
  }
}

module attributes {stable_mosaic.version = 11 : i64} {
  func.func @godcaster_kernel(%arg0: i32, %arg1: i32, %arg2: memref<1x8x128xbf16, #tpu.memory_space<vmem>>, %arg3: memref<8x128xf32, #tpu.memory_space<vmem>>, %arg4: memref<1x1x128xf32, #tpu.memory_space<vmem>>, %arg5: memref<128x128xbf16, #tpu.memory_space<vmem>>, %arg6: memref<1x128xf32, #tpu.memory_space<vmem>>, %arg7: memref<128x128xbf16, #tpu.memory_space<vmem>>, %arg8: memref<1x128xf32, #tpu.memory_space<vmem>>, %arg9: memref<1x128xf32, #tpu.memory_space<vmem>>, %arg10: memref<128x128xbf16, #tpu.memory_space<vmem>>, %arg11: memref<1x128xf32, #tpu.memory_space<vmem>>, %arg12: memref<128x128xbf16, #tpu.memory_space<vmem>>, %arg13: memref<1x128xf32, #tpu.memory_space<vmem>>, %arg14: memref<1x8x128xf32, #tpu.memory_space<vmem>>) attributes {dimension_semantics = [#tpu.dimension_semantics<parallel>, #tpu.dimension_semantics<parallel>], iteration_bounds = array<i64: 1, 2>, scalar_prefetch = 0 : i64, scratch_operands = 0 : i64, tpu.core_type = #tpu.core_type<tc>, window_params = [{transform_indices = @transform_0, window_bounds = array<i64: 1, 8, 128>}, {transform_indices = @transform_1, window_bounds = array<i64: 8, 128>}, {transform_indices = @transform_2, window_bounds = array<i64: 1, 1, 128>}, {pipeline_mode = #tpu.pipeline_mode<synchronous>, transform_indices = @transform_3, window_bounds = array<i64: 128, 128>}, {pipeline_mode = #tpu.pipeline_mode<synchronous>, transform_indices = @transform_4, window_bounds = array<i64: 1, 128>}, {pipeline_mode = #tpu.pipeline_mode<synchronous>, transform_indices = @transform_5, window_bounds = array<i64: 128, 128>}, {pipeline_mode = #tpu.pipeline_mode<synchronous>, transform_indices = @transform_6, window_bounds = array<i64: 1, 128>}, {pipeline_mode = #tpu.pipeline_mode<synchronous>, transform_indices = @transform_7, window_bounds = array<i64: 1, 128>}, {pipeline_mode = #tpu.pipeline_mode<synchronous>, transform_indices = @transform_8, window_bounds = array<i64: 128, 128>}, {pipeline_mode = #tpu.pipeline_mode<synchronous>, transform_indices = @transform_9, window_bounds = array<i64: 1, 128>}, {pipeline_mode = #tpu.pipeline_mode<synchronous>, transform_indices = @transform_10, window_bounds = array<i64: 128, 128>}, {pipeline_mode = #tpu.pipeline_mode<synchronous>, transform_indices = @transform_11, window_bounds = array<i64: 1, 128>}, {transform_indices = @transform_12, window_bounds = array<i64: 1, 8, 128>}]} {
    %c0 = arith.constant 0 : index
    %c0_0 = arith.constant 0 : index
    %c0_1 = arith.constant 0 : index
    %0 = vector.load %arg2[%c0, %c0_0, %c0_1] : memref<1x8x128xbf16, #tpu.memory_space<vmem>>, vector<1x8x128xbf16>
    %1 = vector.shape_cast %0 : vector<1x8x128xbf16> to vector<8x128xbf16>
    %c0_2 = arith.constant 0 : index
    %c0_3 = arith.constant 0 : index
    %2 = vector.load %arg5[%c0_2, %c0_3] : memref<128x128xbf16, #tpu.memory_space<vmem>>, vector<128x128xbf16>
    %cst = arith.constant dense<0.000000e+00> : vector<8x128xf32>
    %3 = tpu.matmul %1, %2, %cst {dimension_numbers = #tpu.dot_dimension_numbers<[1], [0], [0], [1], [0, 0, 1, 1], [], []>} : vector<8x128xbf16>, vector<128x128xbf16>, vector<8x128xf32> -> vector<8x128xf32>
    %c0_4 = arith.constant 0 : index
    %c0_5 = arith.constant 0 : index
    %4 = vector.load %arg6[%c0_4, %c0_5] : memref<1x128xf32, #tpu.memory_space<vmem>>, vector<1x128xf32>
    %5 = vector.broadcast %4 : vector<1x128xf32> to vector<8x128xf32>
    %6 = arith.addf %3, %5 : vector<8x128xf32>
    %7 = math.tanh %6 : vector<8x128xf32>
    %8 = arith.truncf %7 : vector<8x128xf32> to vector<8x128xbf16>
    %c0_6 = arith.constant 0 : index
    %c0_7 = arith.constant 0 : index
    %9 = vector.load %arg7[%c0_6, %c0_7] : memref<128x128xbf16, #tpu.memory_space<vmem>>, vector<128x128xbf16>
    %cst_8 = arith.constant dense<0.000000e+00> : vector<8x128xf32>
    %10 = tpu.matmul %8, %9, %cst_8 {dimension_numbers = #tpu.dot_dimension_numbers<[1], [0], [0], [1], [0, 0, 1, 1], [], []>} : vector<8x128xbf16>, vector<128x128xbf16>, vector<8x128xf32> -> vector<8x128xf32>
    %c0_9 = arith.constant 0 : index
    %c0_10 = arith.constant 0 : index
    %11 = vector.load %arg3[%c0_9, %c0_10] : memref<8x128xf32, #tpu.memory_space<vmem>>, vector<8x128xf32>
    %12 = arith.addf %10, %11 : vector<8x128xf32>
    %c0_11 = arith.constant 0 : index
    %c0_12 = arith.constant 0 : index
    %c0_13 = arith.constant 0 : index
    %13 = vector.load %arg4[%c0_11, %c0_12, %c0_13] : memref<1x1x128xf32, #tpu.memory_space<vmem>>, vector<1x1x128xf32>
    %14 = vector.shape_cast %13 : vector<1x1x128xf32> to vector<1x128xf32>
    %15 = vector.broadcast %14 : vector<1x128xf32> to vector<8x128xf32>
    %16 = arith.addf %12, %15 : vector<8x128xf32>
    %cst_14 = arith.constant dense<0.000000e+00> : vector<8xf32>
    %17 = vector.multi_reduction <add>, %16, %cst_14 [1] : vector<8x128xf32> to vector<8xf32>
    %18 = vector.shape_cast %17 : vector<8xf32> to vector<8x1xf32>
    %cst_15 = arith.constant 3.125000e-02 : f32
    %19 = vector.broadcast %cst_15 : f32 to vector<8x1xf32>
    %20 = arith.mulf %18, %19 : vector<8x1xf32>
    %21 = vector.broadcast %20 : vector<8x1xf32> to vector<8x128xf32>
    %22 = arith.subf %16, %21 : vector<8x128xf32>
    %23 = arith.mulf %22, %22 : vector<8x128xf32>
    %cst_16 = arith.constant dense<0.000000e+00> : vector<8xf32>
    %24 = vector.multi_reduction <add>, %23, %cst_16 [1] : vector<8x128xf32> to vector<8xf32>
    %25 = vector.shape_cast %24 : vector<8xf32> to vector<8x1xf32>
    %26 = arith.mulf %20, %20 : vector<8x1xf32>
    %cst_17 = arith.constant 9.600000e+01 : f32
    %27 = vector.broadcast %cst_17 : f32 to vector<8x1xf32>
    %28 = arith.mulf %27, %26 : vector<8x1xf32>
    %29 = arith.subf %25, %28 : vector<8x1xf32>
    %cst_18 = arith.constant 3.125000e-02 : f32
    %30 = vector.broadcast %cst_18 : f32 to vector<8x1xf32>
    %31 = arith.mulf %29, %30 : vector<8x1xf32>
    %cst_19 = arith.constant 9.99999996E-13 : f32
    %32 = vector.broadcast %cst_19 : f32 to vector<8x1xf32>
    %33 = arith.addf %31, %32 : vector<8x1xf32>
    %34 = math.rsqrt %33 : vector<8x1xf32>
    %35 = vector.broadcast %34 : vector<8x1xf32> to vector<8x128xf32>
    %36 = arith.mulf %22, %35 : vector<8x128xf32>
    %c0_20 = arith.constant 0 : index
    %c0_21 = arith.constant 0 : index
    %37 = vector.load %arg8[%c0_20, %c0_21] : memref<1x128xf32, #tpu.memory_space<vmem>>, vector<1x128xf32>
    %38 = vector.broadcast %37 : vector<1x128xf32> to vector<8x128xf32>
    %39 = arith.mulf %36, %38 : vector<8x128xf32>
    %c0_22 = arith.constant 0 : index
    %c0_23 = arith.constant 0 : index
    %40 = vector.load %arg9[%c0_22, %c0_23] : memref<1x128xf32, #tpu.memory_space<vmem>>, vector<1x128xf32>
    %41 = vector.broadcast %40 : vector<1x128xf32> to vector<8x128xf32>
    %42 = arith.addf %39, %41 : vector<8x128xf32>
    %43 = arith.truncf %42 : vector<8x128xf32> to vector<8x128xbf16>
    %c0_24 = arith.constant 0 : index
    %c0_25 = arith.constant 0 : index
    %44 = vector.load %arg10[%c0_24, %c0_25] : memref<128x128xbf16, #tpu.memory_space<vmem>>, vector<128x128xbf16>
    %cst_26 = arith.constant dense<0.000000e+00> : vector<8x128xf32>
    %45 = tpu.matmul %43, %44, %cst_26 {dimension_numbers = #tpu.dot_dimension_numbers<[1], [0], [0], [1], [0, 0, 1, 1], [], []>} : vector<8x128xbf16>, vector<128x128xbf16>, vector<8x128xf32> -> vector<8x128xf32>
    %c0_27 = arith.constant 0 : index
    %c0_28 = arith.constant 0 : index
    %46 = vector.load %arg11[%c0_27, %c0_28] : memref<1x128xf32, #tpu.memory_space<vmem>>, vector<1x128xf32>
    %47 = vector.broadcast %46 : vector<1x128xf32> to vector<8x128xf32>
    %48 = arith.addf %45, %47 : vector<8x128xf32>
    %49 = math.tanh %48 : vector<8x128xf32>
    %50 = arith.truncf %49 : vector<8x128xf32> to vector<8x128xbf16>
    %c0_29 = arith.constant 0 : index
    %c0_30 = arith.constant 0 : index
    %51 = vector.load %arg12[%c0_29, %c0_30] : memref<128x128xbf16, #tpu.memory_space<vmem>>, vector<128x128xbf16>
    %cst_31 = arith.constant dense<0.000000e+00> : vector<8x128xf32>
    %52 = tpu.matmul %50, %51, %cst_31 {dimension_numbers = #tpu.dot_dimension_numbers<[1], [0], [0], [1], [0, 0, 1, 1], [], []>} : vector<8x128xbf16>, vector<128x128xbf16>, vector<8x128xf32> -> vector<8x128xf32>
    %c0_32 = arith.constant 0 : index
    %c0_33 = arith.constant 0 : index
    %53 = vector.load %arg13[%c0_32, %c0_33] : memref<1x128xf32, #tpu.memory_space<vmem>>, vector<1x128xf32>
    %54 = vector.broadcast %53 : vector<1x128xf32> to vector<8x128xf32>
    %55 = arith.addf %52, %54 : vector<8x128xf32>
    %c0_34 = arith.constant 0 : index
    %c0_35 = arith.constant 0 : index
    %c0_36 = arith.constant 0 : index
    %56 = vector.load %arg14[%c0_34, %c0_35, %c0_36] : memref<1x8x128xf32, #tpu.memory_space<vmem>>, vector<1x8x128xf32>
    %57 = vector.shape_cast %56 : vector<1x8x128xf32> to vector<8x128xf32>
    %58 = vector.shape_cast %55 : vector<8x128xf32> to vector<1x8x128xf32>
    tpu.vector_store %arg14[%c0_34, %c0_35, %c0_36], %58 {strides = array<i32>} : memref<1x8x128xf32, #tpu.memory_space<vmem>>, vector<1x8x128xf32>,
    return
  }
  func.func @transform_0(%arg0: i32, %arg1: i32) -> (i32, i32, i32) {
    %c0_i32 = arith.constant 0 : i32
    %c0_i32_0 = arith.constant 0 : i32
    return %arg1, %arg0, %c0_i32 : i32, i32, i32
  }
  func.func @transform_1(%arg0: i32, %arg1: i32) -> (i32, i32) {
    %c0_i32 = arith.constant 0 : i32
    %c0_i32_0 = arith.constant 0 : i32
    return %arg0, %c0_i32 : i32, i32
  }
  func.func @transform_2(%arg0: i32, %arg1: i32) -> (i32, i32, i32) {
    %c0_i32 = arith.constant 0 : i32
    %c0_i32_0 = arith.constant 0 : i32
    %c0_i32_1 = arith.constant 0 : i32
    return %arg1, %c0_i32, %c0_i32_0 : i32, i32, i32
  }
  func.func @transform_3(%arg0: i32, %arg1: i32) -> (i32, i32) {
    %c0_i32 = arith.constant 0 : i32
    %c0_i32_0 = arith.constant 0 : i32
    %c0_i32_1 = arith.constant 0 : i32
    return %c0_i32, %c0_i32_0 : i32, i32
  }
  func.func @transform_4(%arg0: i32, %arg1: i32) -> (i32, i32) {
    %c0_i32 = arith.constant 0 : i32
    %c0_i32_0 = arith.constant 0 : i32
    %c0_i32_1 = arith.constant 0 : i32
    return %c0_i32, %c0_i32_0 : i32, i32
  }
  func.func @transform_5(%arg0: i32, %arg1: i32) -> (i32, i32) {
    %c0_i32 = arith.constant 0 : i32
    %c0_i32_0 = arith.constant 0 : i32
    %c0_i32_1 = arith.constant 0 : i32
    return %c0_i32, %c0_i32_0 : i32, i32
  }
  func.func @transform_6(%arg0: i32, %arg1: i32) -> (i32, i32) {
    %c0_i32 = arith.constant 0 : i32
    %c0_i32_0 = arith.constant 0 : i32
    %c0_i32_1 = arith.constant 0 : i32
    return %c0_i32, %c0_i32_0 : i32, i32
  }
  func.func @transform_7(%arg0: i32, %arg1: i32) -> (i32, i32) {
    %c0_i32 = arith.constant 0 : i32
    %c0_i32_0 = arith.constant 0 : i32
    %c0_i32_1 = arith.constant 0 : i32
    return %c0_i32, %c0_i32_0 : i32, i32
  }
  func.func @transform_8(%arg0: i32, %arg1: i32) -> (i32, i32) {
    %c0_i32 = arith.constant 0 : i32
    %c0_i32_0 = arith.constant 0 : i32
    %c0_i32_1 = arith.constant 0 : i32
    return %c0_i32, %c0_i32_0 : i32, i32
  }
  func.func @transform_9(%arg0: i32, %arg1: i32) -> (i32, i32) {
    %c0_i32 = arith.constant 0 : i32
    %c0_i32_0 = arith.constant 0 : i32
    %c0_i32_1 = arith.constant 0 : i32
    return %c0_i32, %c0_i32_0 : i32, i32
  }
  func.func @transform_10(%arg0: i32, %arg1: i32) -> (i32, i32) {
    %c0_i32 = arith.constant 0 : i32
    %c0_i32_0 = arith.constant 0 : i32
    %c0_i32_1 = arith.constant 0 : i32
    return %c0_i32, %c0_i32_0 : i32, i32
  }
  func.func @transform_11(%arg0: i32, %arg1: i32) -> (i32, i32) {
    %c0_i32 = arith.constant 0 : i32
    %c0_i32_0 = arith.constant 0 : i32
    %c0_i32_1 = arith.constant 0 : i32
    return %c0_i32, %c0_i32_0 : i32, i32
  }
  func.func @transform_12(%arg0: i32, %arg1: i32) -> (i32, i32, i32) {
    %c0_i32 = arith.constant 0 : i32
    %c0_i32_0 = arith.constant 0 : i32
    return %arg1, %arg0, %c0_i32 : i32, i32, i32
  }
}

</mosaic_0001>

<bundles_post_ra>
// kernel: tpu_custom_call.1
= control target key start
LH: loop header
LB: loop body
LE: loop exit
PB: predicated region body
PF: predicated region fallthrough
CT: control target
= control target key end

     0   :  { %s2236_s0 = inlined_call_operand.hbm [shape: bf16[2,8,128], index: 0, kind: input, shape index: {}]   ;;  %s2237_s1 = inlined_call_operand.hbm [shape: f32[8,128], index: 1, kind: input, shape index: {}]   ;;  %s2238_s2 = inlined_call_operand.vmem [shape: f32[2,1,128], index: 2, kind: input, shape index: {}]   ;;  %s2239_s3 = inlined_call_operand.hbm [shape: bf16[128,128], index: 3, kind: input, shape index: {}]   ;;  %s2240_s4 = inlined_call_operand.vmem [shape: f32[1,128], index: 4, kind: input, shape index: {}]   ;;  %s2241_s5 = inlined_call_operand.hbm [shape: bf16[128,128], index: 5, kind: input, shape index: {}]   ;;  %s2242_s6 = inlined_call_operand.vmem [shape: f32[1,128], index: 6, kind: input, shape index: {}]   ;;  %s2243_s7 = inlined_call_operand.vmem [shape: f32[1,128], index: 7, kind: input, shape index: {}]   ;;  %s2244_s8 = inlined_call_operand.hbm [shape: bf16[128,128], index: 8, kind: input, shape index: {}]   ;;  %s2245_s9 = inlined_call_operand.vmem [shape: f32[1,128], index: 9, kind: input, shape index: {}]   ;;  %s2246_s10 = inlined_call_operand.hbm [shape: bf16[128,128], index: 10, kind: input, shape index: {}]   ;;  %s2247_s11 = inlined_call_operand.vmem [shape: f32[1,128], index: 11, kind: input, shape index: {}]   ;;  %s2248_s12 = inlined_call_operand.hbm [shape: f32[2,8,128], index: 12, kind: output, shape index: {}]  }
   0x1   :  { %2255 = sst [smem:[#allocation19_spill]] %s2237_s1 }
   0x2   :  { %2256 = sst [smem:[#allocation20_spill]] %s2241_s5 }
   0x3   :  { %2257 = sst [smem:[#allocation21_spill]] %s2242_s6 }
   0x4   :  { %2258 = sst [smem:[#allocation22_spill]] %s2243_s7 }
   0x5   :  { %2259 = sst [smem:[#allocation23_spill]] %s2245_s9 }
   0x6   :  { %2260 = sst [smem:[#allocation24_spill]] %s2247_s11 }
   0x7   :  { %2261 = sst [smem:[#allocation25_spill]] %s2248_s12 }
   0x8   :  { %17 = vsyncpa [#allocation3], 0 }
   0x9   :  { %19 = vsyncpa [#allocation3 + $0x1], 0 }
   0xa   :  { %20 = vsyncpa [#allocation6], 0 }
   0xb   :  { %21 = vsyncpa [#allocation9], 0 }
   0xc   :  { %22 = vsyncpa [#allocation12], 0 }
   0xd   :  { %23 = vsyncpa [#allocation4], 0 }
   0xe   :  { %25 = vsyncpa [#allocation4 + $0x1], 0  ;;  %s1850_s21 = smov 0   ;;  %s1852_s22 = smov 0  }
   0xf   :  { %s1854_s23 = smov 0   ;;  %s1856_s24 = smov 0  }
  0x10   :  { %s1858_s25 = smov 0   ;;  %s1860_s26 = smov 0  }
  0x11 LB: > { %s2249_s27 = sadd.s32 4294967295, %s1772_s26   ;;  %p1178_p0 = scmp.ge.s32.totalorder %s1772_s26, 1  ;;  %s1772_s26 = sphi %s1860_s26, %s31_s26   ;;  %s1768_s25 = sphi %s1858_s25, %s2289_s25   ;;  %s1764_s24 = sphi %s1856_s24, %s2288_s24   ;;  %s1760_s23 = sphi %s1854_s23, %s2287_s23   ;;  %s1756_s22 = sphi %s1852_s22, %s2286_s22   ;;  %s1752_s21 = sphi %s1850_s21, %s2285_s21  }
  0x12   : > { %p1884_p1 = scmp.eq.s32.totalorder %s2249_s27, 0  ;;  %p345_p2 = scmp.lt.s32.totalorder %s1772_s26, 3 }
  0x13   : > { %s1774_s30 = smov [#allocation5]   ;;  %s1775_s15 = smov [#allocation8]  }
  0x14   : > { %s2262_s28 = scalar_select %p1884_p1, 1, 0 }
  0x15   : > { %p1889_p3 = pnand %p1178_p0, %p345_p2  ;;  %s360_s13 = sshll.u32 %s1774_s30, 4  ;;  %s361_s13 = int_to_ptr.vmem [resolvable:$true] %s360_s13 }
  0x16   : > { %s386_s16 = sshll.u32 %s1775_s15, 4  ;;  %s1776_s17 = smov [#allocation7]   ;;  %s1902_s16 = int_to_ptr.vmem [resolvable:$true] %s386_s16 }
  0x17   : > { %s2263_s29 = scalar_select %p1889_p3, 1, 0 }
  0x18   : > { %p1377_p5 = pneg %p1889_p3  ;;  %s1904_s18 = sshll.u32 %s1776_s17, 4  ;;  %s371_s18 = int_to_ptr.vmem [resolvable:$true] %s1904_s18 }
  0x19   : > { %s2265_s1 = sld [smem:[#allocation19_spill]] }
  0x1a   : > { %p1898_p6 = pnand %p1377_p5, %p1884_p1 }
  0x1c   : > { %p1914_p8 = pneg %p1898_p6 }
  0x1f   : > { %s1508_s30 = scalar_lea.hbm %s2265_s1, 128 }
  0x20   : > { %p1509_p7 = scmp.ne.s32.totalorder %s2265_s1, %s1508_s30  ;;  %p1515_p11 = scmp.lt.u32.totalorder %s1508_s30, %s2265_s1 }
  0x22   : > { %p1511_p9 = pnand %p1914_p8, %p1509_p7 }
  0x24   : > { %p1512_p10 = pneg %p1511_p9 }
  0x26   : > { %p1517_p12 = pnand %p1515_p11, %p1512_p10 }
  0x28   : > { %1520 = shalt.err (!%p1517_p12)
}
  0x29   : > { %s1521_s19 = scalar_lea.vmem %s361_s13, 128  ;;  %p1529_p5 = scmp.lt.s32.totalorder %s361_s13, %s361_s13 }
  0x2a   : > { %p1522_p13 = scmp.ne.s32.totalorder %s361_s13, %s1521_s19  ;;  %p1530_p4 = scmp.lt.s32.totalorder %s1521_s19, %s1521_s19 }
  0x2c   : > { %p1524_p0 = pnand %p1522_p13, %p1914_p8  ;;  %p1531_p3 = por %p1530_p4, %p1529_p5 }
  0x2e   : > { %p1525_p2 = pneg %p1524_p0 }
  0x30   : > { %p1532_p1 = pnand %p1531_p3, %p1525_p2 }
  0x32   : > { %1535 = shalt.err (!%p1532_p1)
}
  0x33   : > { %1380 = dma.hbm_to_vmem [thread:$0]  (!%p1898_p6), %s2265_s1, 128, %s361_s13, [#allocation6]  }
  0x34   : > { %s2267_s5 = sld [smem:[#allocation20_spill]] }
  0x3a   : > { %s1536_s15 = scalar_lea.hbm %s2267_s5, 1024 }
  0x3b   : > { %p1537_p7 = scmp.ne.s32.totalorder %s2267_s5, %s1536_s15  ;;  %p1543_p1 = scmp.lt.u32.totalorder %s1536_s15, %s2267_s5 }
  0x3d   : > { %p1539_p9 = pnand %p1537_p7, %p1914_p8 }
  0x3f   : > { %p1540_p4 = pneg %p1539_p9 }
  0x41   : > { %p1545_p3 = pnand %p1543_p1, %p1540_p4 }
  0x43   : > { %1548 = shalt.err (!%p1545_p3)
}
  0x44   : > { %s1549_s13 = scalar_lea.vmem %s1902_s16, 1024  ;;  %p1557_p13 = scmp.lt.s32.totalorder %s1902_s16, %s1902_s16 }
  0x45   : > { %p1550_p10 = scmp.ne.s32.totalorder %s1902_s16, %s1549_s13  ;;  %p1558_p0 = scmp.lt.s32.totalorder %s1549_s13, %s1549_s13 }
  0x47   : > { %p1552_p11 = pnand %p1550_p10, %p1914_p8  ;;  %p1559_p2 = por %p1558_p0, %p1557_p13 }
  0x49   : > { %p1553_p12 = pneg %p1552_p11 }
  0x4b   : > { %p1560_p5 = pnand %p1559_p2, %p1553_p12 }
  0x4d   : > { %1563 = shalt.err (!%p1560_p5)
}
  0x4e   : > { %s1777_s9 = smov 64   ;;  %s1778_s7 = smov 4  }
  0x4f   : > { %1386 = dma.hbm_to_vmem [thread:$0]  (!%p1898_p6), %s2267_s5, 1024, %s1902_s16, [#allocation9], %s1777_s9, %s1777_s9, %s1778_s7  }
  0x50   : > { %s1564_s15 = scalar_lea.hbm %s2239_s3, 1024 }
  0x51   : > { %p1565_p7 = scmp.ne.s32.totalorder %s2239_s3, %s1564_s15  ;;  %p1571_p1 = scmp.lt.u32.totalorder %s1564_s15, %s2239_s3 }
  0x53   : > { %p1567_p9 = pnand %p1565_p7, %p1914_p8 }
  0x55   : > { %p1568_p4 = pneg %p1567_p9 }
  0x57   : > { %p1573_p3 = pnand %p1571_p1, %p1568_p4 }
  0x59   : > { %1576 = shalt.err (!%p1573_p3)
}
  0x5a   : > { %s1577_s12 = scalar_lea.vmem %s371_s18, 1024  ;;  %p1585_p13 = scmp.lt.s32.totalorder %s371_s18, %s371_s18 }
  0x5b   : > { %p1578_p10 = scmp.ne.s32.totalorder %s371_s18, %s1577_s12  ;;  %p1586_p0 = scmp.lt.s32.totalorder %s1577_s12, %s1577_s12 }
  0x5d   : > { %p1580_p11 = pnand %p1578_p10, %p1914_p8  ;;  %p1587_p2 = por %p1586_p0, %p1585_p13 }
  0x5f   : > { %p1581_p12 = pneg %p1580_p11 }
  0x61   : > { %p1588_p5 = pnand %p1587_p2, %p1581_p12 }
  0x63   : > { %1591 = shalt.err (!%p1588_p5)
}
  0x64   : > { %1383 = dma.hbm_to_vmem [thread:$0]  (!%p1898_p6), %s2239_s3, 1024, %s371_s18, [#allocation6], %s1777_s9, %s1777_s9, %s1778_s7  }
  0x65   : > { %s1779_s27 = smov [#allocation10]   ;;  %s1780_s30 = smov [#allocation11]  }
  0x66   : > { %s405_s20 = sshll.u32 %s1779_s27, 4  ;;  %s421_s15 = sshll.u32 %s1780_s30, 4  ;;  %s406_s20 = int_to_ptr.vmem [resolvable:$true] %s405_s20  ;;  %s422_s15 = int_to_ptr.vmem [resolvable:$true] %s421_s15 }
  0x67   : > { %s1592_s13 = scalar_lea.hbm %s2244_s8, 1024 }
  0x68   : > { %p1593_p7 = scmp.ne.s32.totalorder %s2244_s8, %s1592_s13  ;;  %p1599_p1 = scmp.lt.u32.totalorder %s1592_s13, %s2244_s8 }
  0x6a   : > { %p1595_p9 = pnand %p1593_p7, %p1914_p8 }
  0x6c   : > { %p1596_p4 = pneg %p1595_p9 }
  0x6e   : > { %p1601_p3 = pnand %p1599_p1, %p1596_p4 }
  0x70   : > { %1604 = shalt.err (!%p1601_p3)
}
  0x71   : > { %s1605_s18 = scalar_lea.vmem %s406_s20, 1024  ;;  %p1613_p13 = scmp.lt.s32.totalorder %s406_s20, %s406_s20 }
  0x72   : > { %p1606_p10 = scmp.ne.s32.totalorder %s406_s20, %s1605_s18  ;;  %p1614_p0 = scmp.lt.s32.totalorder %s1605_s18, %s1605_s18 }
  0x74   : > { %p1608_p11 = pnand %p1606_p10, %p1914_p8  ;;  %p1615_p2 = por %p1614_p0, %p1613_p13 }
  0x76   : > { %p1609_p12 = pneg %p1608_p11 }
  0x78   : > { %p1616_p5 = pnand %p1615_p2, %p1609_p12 }
  0x7a   : > { %1619 = shalt.err (!%p1616_p5)
}
  0x7b   : > { %1389 = dma.hbm_to_vmem [thread:$0]  (!%p1898_p6), %s2244_s8, 1024, %s406_s20, [#allocation9], %s1777_s9, %s1777_s9, %s1778_s7  }
  0x7c   : > { %s1620_s30 = scalar_lea.hbm %s2246_s10, 1024 }
  0x7d   : > { %p1621_p7 = scmp.ne.s32.totalorder %s2246_s10, %s1620_s30  ;;  %p1627_p1 = scmp.lt.u32.totalorder %s1620_s30, %s2246_s10 }
  0x7f   : > { %p1623_p9 = pnand %p1621_p7, %p1914_p8 }
  0x81   : > { %p1624_p4 = pneg %p1623_p9 }
  0x83   : > { %p1629_p3 = pnand %p1627_p1, %p1624_p4 }
  0x85   : > { %1632 = shalt.err (!%p1629_p3)
}
  0x86   : > { %s1633_s1 = scalar_lea.vmem %s422_s15, 1024  ;;  %p1641_p13 = scmp.lt.s32.totalorder %s422_s15, %s422_s15 }
  0x87   : > { %p1634_p10 = scmp.ne.s32.totalorder %s422_s15, %s1633_s1  ;;  %p1642_p0 = scmp.lt.s32.totalorder %s1633_s1, %s1633_s1 }
  0x89   : > { %p1636_p11 = pnand %p1634_p10, %p1914_p8  ;;  %p1643_p2 = por %p1642_p0, %p1641_p13 }
  0x8b   : > { %p1637_p12 = pneg %p1636_p11 }
  0x8d   : > { %p1644_p5 = pnand %p1643_p2, %p1637_p12 }
  0x8f   : > { %1647 = shalt.err (!%p1644_p5)
}
  0x90   : > { %1392 = dma.hbm_to_vmem [thread:$0]  (!%p1898_p6), %s2246_s10, 1024, %s422_s15, [#allocation12], %s1777_s9, %s1777_s9, %s1778_s7  }
  0x91   : > { %s1177_s11 = sadd.s32 4294967294, %s1772_s26   ;;  %s40_s14 = sadd.s32 1, %s1768_s25 }
  0x92   : > { %s52_s5 = sadd.s32 1, %s1760_s23  ;;  %p41_p8 = scmp.ge.s32.totalorder %s40_s14, 2 }
  0x93   : > { %p59_p7 = scmp.ne.s32.totalorder %s1760_s23, %s1756_s22  ;;  %p60_p9 = scmp.eq.s32.totalorder %s1772_s26, 0 }
  0x94   : > { %p65_p4 = scmp.ne.s32.totalorder %s1756_s22, %s1752_s21  ;;  %s2291_s14 = smov (%p41_p8, %s40_s14), 0 }
  0x95   : > { %p2030_p1 = por %p60_p9, %p59_p7  ;;  %p2269_p3 = scmp.ne.s32.totalorder %s2262_s28, 0 }
  0x96   : > { %s47_s7 = ssub.s32 %s1768_s25, %s2291_s14  ;;  %s2271_s15 = sadd.s32 4294967295, %s1772_s26  }
  0x97   : > { %p2036_p6 = por %p2269_p3, %p65_p4  ;;  %p332_p10 = scmp.eq.s32.totalorder %s2271_s15, 1 }
  0x98   : > { %p50_p11 = scmp.eq.s32.totalorder %s47_s7, 0  ;;  %p338_p12 = scmp.eq.s32.totalorder %s1177_s11, 1 }
  0x99   : > { %p2044_p13 = por %p332_p10, %p59_p7  ;;  %p1406_p0 = scmp.lt.s32.totalorder %s1772_s26, 2 }
  0x9a   : > { %s2050_s27 = scalar_select %p50_p11, %s1760_s23, %s52_s5  }
  0x9b   : > { %s2272_s16 = scalar_select %p2044_p13, 1, 0 }
  0x9c   : > { %p2052_p2 = por %p338_p12, %p65_p4  ;;  %s438_s17 = sand.u32 1, %s1760_s23  }
  0x9d   : > { %s1185_s19 = sshll.u32 %s438_s17, 2  ;;  %s1186_s13 = sshll.u32 %s1768_s25, 6 }
  0x9e   : > { %s2273_s30 = scalar_select %p2052_p2, 1, 0 }
  0x9f   : > { %s2061_s20 = scalar_lea.hbm %s2236_s0, %s1186_s13  ;;  %s442_s18 = scalar_lea.vmem [#allocation2], %s1185_s19 }
  0xa0   : > { %s450_s11 = sshll.u32 %s442_s18, 4  ;;  %p2067_p5 = pnand %p1406_p0, %p2030_p1  ;;  %s2063_s11 = int_to_ptr.vmem [resolvable:$true] %s450_s11 }
  0xa1   : > { %s439_s7 = scalar_lea.sflag [#allocation3], %s438_s17  ;;  %s1648_s15 = scalar_lea.hbm %s2061_s20, 64 }
  0xa2   : > { %p1649_p8 = scmp.ne.s32.totalorder %s2061_s20, %s1648_s15  ;;  %p1650_p7 = pneg %p2067_p5 }
  0xa3   : > { %s1653_s12 = scalar_lea.hbm %s2236_s0, 128  ;;  %p1654_p1 = scmp.lt.u32.totalorder %s2061_s20, %s2236_s0 }
  0xa4   : > { %p1651_p9 = pnand %p1650_p7, %p1649_p8  ;;  %p1655_p3 = scmp.lt.u32.totalorder %s1653_s12, %s1648_s15 }
  0xa5   : > { %p1657_p11 = scmp.lt.u32.totalorder %s1648_s15, %s2061_s20 }
  0xa6   : > { %p1652_p4 = pneg %p1651_p9  ;;  %p1656_p10 = por %p1655_p3, %p1654_p1 }
  0xa8   : > { %p1658_p12 = por %p1657_p11, %p1656_p10 }
  0xaa   : > { %p1659_p0 = pnand %p1658_p12, %p1652_p4 }
  0xac   : > { %1662 = shalt.err (!%p1659_p0)
}
  0xad   : > { %s1663_s17 = scalar_lea.vmem %s2063_s11, 64  ;;  %s1781_s18 = smov [#allocation2]  }
  0xae   : > { %p1664_p8 = scmp.ne.s32.totalorder %s2063_s11, %s1663_s17  ;;  %s1668_s19 = sshll.u32 %s1781_s18, 4  ;;  %s1669_s19 = int_to_ptr.vmem [resolvable:$false] %s1668_s19 }
  0xaf   : > { %s1670_s13 = scalar_lea.vmem %s1669_s19, 128  ;;  %p1671_p13 = scmp.lt.s32.totalorder %s2063_s11, %s1669_s19 }
  0xb0   : > { %p1666_p9 = pnand %p1664_p8, %p1650_p7  ;;  %p1672_p1 = scmp.lt.s32.totalorder %s1670_s13, %s1663_s17 }
  0xb2   : > { %p1667_p2 = pneg %p1666_p9  ;;  %p1673_p3 = por %p1672_p1, %p1671_p13 }
  0xb4   : > { %p1674_p10 = pnand %p1673_p3, %p1667_p2 }
  0xb6   : > { %1677 = shalt.err (!%p1674_p10)
}
  0xb7   : > { %1396 = dma.hbm_to_vmem [thread:$0]  (!%p2067_p5), %s2061_s20, 64, %s2063_s11, %s439_s7  }
  0xb8   : > { %p2275_p4 = scmp.ne.s32.totalorder %s2263_s29, 0 }
  0xb9   : > { %s2099_s15 = sand.u32 (!%p2275_p4), 1, %s1756_s22  }
  0xba   : > { %465 = sbr.rel (%p2275_p4) target bundleno = 1448 (0x5a8), region = 68  ;;  %s1188_s12 = sshll.u32 (!%p2275_p4), %s2099_s15, 2 }
  0xbb   : > { %s468_s6 = scalar_lea.sflag (!%p2275_p4), [#allocation3], %s2099_s15  ;;  %s2103_s1 = scalar_lea.vmem (!%p2275_p4), [#allocation2], %s1188_s12 }
  0xc1   : > { %1731 = dma.done.wait (%p2036_p6), %s468_s6, 64  }
  0xc2   : > { %1733 = vsyncadd (%p2036_p6), %s468_s6, 4294967232  ;;  %p2276_p13 = scmp.ne.s32.totalorder %s2262_s28, 0 }
  0xc4   : > { %1735 = dma.done.wait (%p2276_p13), [#allocation6], 1152  }
  0xc5   : > { %1737 = vsyncadd (%p2276_p13), [#allocation6], 4294966144 }
  0xc6   : > { %1739 = dma.done.wait (%p2276_p13), [#allocation9], 2048  }
  0xc7   : > { %1741 = vsyncadd (%p2276_p13), [#allocation9], 4294965248 }
  0xc8   : > { %1743 = dma.done.wait (%p2276_p13), [#allocation12], 1024  }
  0xc9   : > { %1745 = vsyncadd (%p2276_p13), [#allocation12], 4294966272  ;;  %v1782_v0 = vmov 0.0   ;;  %vm1783_vm0 = vmmov 0   ;;  %v1470_v1 = vld [vmem:[#allocation7] sm:$0xff]   ;;  %v1471_v2 = vld [vmem:[#allocation7 + $0x8] sm:$0xff]  }
  0xca   : > { %1273 = vmatprep.subr.bf16.mxu0 %v1782_v0  ;;  %1289 = vmatprep.mubr.msk.bf16.mxu0 %vm1783_vm0, %v1782_v0  ;;  %v1472_v3 = vld [vmem:[#allocation7 + $0x10] sm:$0xff]   ;;  %v1478_v4 = vld [vmem:[#allocation8] sm:$0xff]   ;;  %v1473_v5 = vld [vmem:[#allocation7 + $0x18] sm:$0xff]   ;;  %p535_p6 = scmp.lt.s32.totalorder %s1764_s24, 1  ;;  %s2277_s18 = sld [smem:[#allocation21_spill]] }
  0xcb   : > { %1293 = vmatprep.subr.bf16.mxu1 %v1782_v0  ;;  %1309 = vmatprep.mubr.msk.bf16.mxu1 %vm1783_vm0, %v1782_v0  ;;  %v1479_v6 = vld [vmem:[#allocation8 + $0x8] sm:$0xff]   ;;  %v1474_v7 = vld [vmem:[#allocation7 + $0x20] sm:$0xff]   ;;  %v1480_v8 = vld [vmem:[#allocation8 + $0x10] sm:$0xff]   ;;  %s2278_s12 = sld [smem:[#allocation22_spill]]  ;;  %s2279_s28 = sld [smem:[#allocation23_spill]] }
  0xcc   : > { %1274 = vmatpush3.bf16.msra.mxu0 %v1470_v1  ;;  %1294 = vmatpush3.bf16.msra.mxu1 %v1478_v4  ;;  %v1475_v9 = vld [vmem:[#allocation7 + $0x28] sm:$0xff]   ;;  %v1481_v10 = vld [vmem:[#allocation8 + $0x18] sm:$0xff]   ;;  %v1476_v11 = vld [vmem:[#allocation7 + $0x30] sm:$0xff]   ;;  %s536_s9 = scalar_select %p535_p6, %s1764_s24, 1 }
  0xcd   : > { %1275 = vmatprep.subr.bf16.mxu0 %v1782_v0  ;;  %1295 = vmatprep.subr.bf16.mxu1 %v1782_v0  ;;  %v1477_v12 = vld [vmem:[#allocation7 + $0x38] sm:$0xff]   ;;  %v539_v13 = vld [vmem:[%s2103_s1] sm:$0xf]  ;;  %v1482_v14 = vld [vmem:[#allocation8 + $0x20] sm:$0xff]   ;;  %s1194_s29 = sshll.u32 %s2099_s15, 3  ;;  %s2280_s11 = sld [smem:[#allocation24_spill]] }
  0xce   : > { %v1483_v15 = vld [vmem:[#allocation8 + $0x28] sm:$0xff]   ;;  %v1484_v16 = vld [vmem:[#allocation8 + $0x30] sm:$0xff]   ;;  %v1485_v17 = vld [vmem:[#allocation8 + $0x38] sm:$0xff]   ;;  %s537_s5 = scalar_lea.vmem %s2238_s2, %s536_s9  ;;  %s534_s7 = scalar_lea.vmem [#allocation13], %s1194_s29 }
  0xcf   : > { %v1195_v18 = vld [vmem:[%s2240_s4] ss:$0 sm:$0xff]  ;;  %v669_v26 = vld [vmem:[#allocation5] sm:$0xff]  ;;  %v1486_v34 = vld [vmem:[#allocation10] sm:$0xff]   ;;  %s1037_s17 = sshll.u32 %s534_s7, 4  ;;  %s2281_s13 = sld [smem:[#allocation25_spill]]  ;;  %s2189_s17 = int_to_ptr.vmem [resolvable:$true] %s1037_s17 }
  0xd0   : > { %1276 = vmatpush3.bf16.msra.mxu0 %v1471_v2  ;;  %1296 = vmatpush3.bf16.msra.mxu1 %v1479_v6  ;;  %v1212_v28 = vld [vmem:[%s537_s5] ss:$0 sm:$0xff]  ;;  %v1487_v35 = vld [vmem:[#allocation10 + $0x8] sm:$0xff]   ;;  %v1489_v41 = vld [vmem:[#allocation10 + $0x18] sm:$0xff]   ;;  %s1234_s5 = sshll.u32 %s1764_s24, 7  ;;  %s1023_s6 = scalar_lea.sflag [#allocation4], %s2099_s15 }
  0xd1   : > { %1277 = vmatprep.subr.bf16.mxu0 %v1782_v0  ;;  %1297 = vmatprep.subr.bf16.mxu1 %v1782_v0  ;;  %v1488_v40 = vld [vmem:[#allocation10 + $0x10] sm:$0xff]   ;;  %v1490_v42 = vld [vmem:[#allocation10 + $0x20] sm:$0xff]   ;;  %v1491_v43 = vld [vmem:[#allocation10 + $0x28] sm:$0xff]   ;;  %s1678_s24 = scalar_lea.vmem %s2189_s17, 128  ;;  %p2282_p5 = scmp.ne.s32.totalorder %s2272_s16, 0 }
  0xd2   : > { %v1492_v44 = vld [vmem:[#allocation10 + $0x30] sm:$0xff]   ;;  %v1493_v45 = vld [vmem:[#allocation10 + $0x38] sm:$0xff]   ;;  %v1494_v46 = vld [vmem:[#allocation11] sm:$0xff]   ;;  %p1679_p2 = scmp.ne.s32.totalorder %s2189_s17, %s1678_s24  ;;  %s1784_s1 = smov [#allocation13]  }
  0xd3   : > { %v1495_v47 = vld [vmem:[#allocation11 + $0x8] sm:$0xff]   ;;  %v1496_v48 = vld [vmem:[#allocation11 + $0x10] sm:$0xff]   ;;  %v1497_v49 = vld [vmem:[#allocation11 + $0x18] sm:$0xff]  }
  0xd4   : > { %1278 = vmatpush3.bf16.msra.mxu0 %v1472_v3  ;;  %1298 = vmatpush3.bf16.msra.mxu1 %v1480_v8  ;;  %v1213_v57 = vld [vmem:[%s2277_s18] ss:$0 sm:$0xff]  ;;  %v1498_v63 = vld [vmem:[#allocation11 + $0x20] sm:$0xff]   ;;  %v1499_v1 = vld [vmem:[#allocation11 + $0x28] sm:$0xff]   ;;  %p1680_p7 = pnand %p1679_p2, %p2282_p5 }
  0xd5   : > { %1279 = vmatprep.subr.bf16.mxu0 %v1782_v0  ;;  %1299 = vmatprep.subr.bf16.mxu1 %v1782_v0  ;;  %v1214_v59 = vld [vmem:[%s2278_s12] ss:$0 sm:$0xff]  ;;  %v1501_v3 = vld [vmem:[#allocation11 + $0x38] sm:$0xff]   ;;  %s2187_s12 = scalar_lea.hbm %s2281_s13, %s1234_s5 }
  0xd6   : > { %v1500_v2 = vld [vmem:[#allocation11 + $0x30] sm:$0xff]   ;;  %p1681_p11 = pneg %p1680_p7 }
  0xd7   : > { %v1215_v4 = vld [vmem:[%s2279_s28] ss:$0 sm:$0xff]  ;;  %s1682_s28 = sshll.u32 %s1784_s1, 4  ;;  %s1683_s28 = int_to_ptr.vmem [resolvable:$false] %s1682_s28 }
  0xd8   : > { %1280 = vmatpush3.bf16.msra.mxu0 %v1473_v5  ;;  %1300 = vmatpush3.bf16.msra.mxu1 %v1481_v10  ;;  %s1684_s29 = scalar_lea.vmem %s1683_s28, 256  ;;  %p1685_p12 = scmp.lt.s32.totalorder %s2189_s17, %s1683_s28 }
  0xd9   : > { %1281 = vmatprep.subr.bf16.mxu0 %v1782_v0  ;;  %1301 = vmatprep.subr.bf16.mxu1 %v1782_v0  ;;  %p1686_p0 = scmp.lt.s32.totalorder %s1684_s29, %s1678_s24 }
  0xdb   : > { %p1687_p8 = por %p1686_p0, %p1685_p12 }
  0xdc   : > { %1282 = vmatpush3.bf16.msra.mxu0 %v1474_v7  ;;  %1302 = vmatpush3.bf16.msra.mxu1 %v1482_v14 }
  0xdd   : > { %1283 = vmatprep.subr.bf16.mxu0 %v1782_v0  ;;  %1303 = vmatprep.subr.bf16.mxu1 %v1782_v0  ;;  %p1688_p9 = pnand %p1687_p8, %p1681_p11 }
  0xe0   : > { %1284 = vmatpush3.bf16.msra.mxu0 %v1475_v9  ;;  %1304 = vmatpush3.bf16.msra.mxu1 %v1483_v15 }
  0xe1   : > { %1285 = vmatprep.subr.bf16.mxu0 %v1782_v0  ;;  %1305 = vmatprep.subr.bf16.mxu1 %v1782_v0 }
  0xe4   : > { %1286 = vmatpush3.bf16.msra.mxu0 %v1476_v11  ;;  %1306 = vmatpush3.bf16.msra.mxu1 %v1484_v16 }
  0xe5   : > { %1287 = vmatprep.subr.bf16.mxu0 %v1782_v0  ;;  %1307 = vmatprep.subr.bf16.mxu1 %v1782_v0 }
  0xe8   : > { %1288 = vmatpush3.bf16.msra.mxu0 %v1477_v12  ;;  %1308 = vmatpush3.bf16.msra.mxu1 %v1485_v17 }
  0xe9   : > { %1313 = vmatprep.subr.bf16.mxu0 %v1782_v0  ;;  %1333 = vmatprep.subr.bf16.mxu1 %v1782_v0 }
  0xeb   : > { %1290 = vmatmul.mubr.bf16.vlgmr.msra.gmra.mrb[0].mxu0 %v539_v13 }
  0xec   : > { %1329 = vmatprep.mubr.msk.bf16.mxu0 %vm1783_vm0, %v1782_v0  ;;  %1314 = vmatpush3.bf16.msra.mxu0 %v1486_v34 }
  0xed   : > { %1315 = vmatprep.subr.bf16.mxu0 %v1782_v0 }
  0xf0   : > { %1316 = vmatpush3.bf16.msra.mxu0 %v1487_v35 }
  0xf1   : > { %1317 = vmatprep.subr.bf16.mxu0 %v1782_v0 }
  0xf4   : > { %1318 = vmatpush3.bf16.msra.mxu0 %v1488_v40 }
  0xf5   : > { %1319 = vmatprep.subr.bf16.mxu0 %v1782_v0 }
  0xf8   : > { %1320 = vmatpush3.bf16.msra.mxu0 %v1489_v41 }
  0xf9   : > { %1321 = vmatprep.subr.bf16.mxu0 %v1782_v0 }
  0xfc   : > { %1322 = vmatpush3.bf16.msra.mxu0 %v1490_v42 }
  0xfd   : > { %1323 = vmatprep.subr.bf16.mxu0 %v1782_v0 }
 0x100   : > { %1324 = vmatpush3.bf16.msra.mxu0 %v1491_v43 }
 0x101   : > { %1325 = vmatprep.subr.bf16.mxu0 %v1782_v0 }
 0x104   : > { %1326 = vmatpush3.bf16.msra.mxu0 %v1492_v44 }
 0x105   : > { %1327 = vmatprep.subr.bf16.mxu0 %v1782_v0 }
 0x108   : > { %1328 = vmatpush3.bf16.msra.mxu0 %v1493_v45 }
 0x1be   : > { %v645_v19 = vpop.f32.mrb[0].mxu0 }
 0x1bf   : > { %v646_v20 = vadd.f32 %v1195_v18, %v645_v19  ;;  %v1291_v21 = vpop.f32.mrb[1].mxu0 }
 0x1c0   : > { %v648_v22 = vpop.f32.mrb[2].mxu0 }
 0x1c1   : > { %1502 = vtanh.f32 %v646_v20  ;;  %v1292_v23 = vpop.f32.mrb[3].mxu0 }
 0x1cb   : > { %v1503_v24 = vpop.eup %1502 }
 0x1cc   : > { %v652_v25 = vpack.c.bf16 %v1503_v24, %v1503_v24 }
 0x1ce   : > { %1310 = vmatmul.mubr.bf16.vlgmr.msra.gmra.mrb[0].mxu1 %v652_v25 }
 0x1cf   : > { %1349 = vmatprep.mubr.msk.bf16.mxu1 %vm1783_vm0, %v1782_v0  ;;  %1334 = vmatpush3.bf16.msra.mxu1 %v1494_v46 }
 0x1d0   : > { %1335 = vmatprep.subr.bf16.mxu1 %v1782_v0 }
 0x1d3   : > { %1336 = vmatpush3.bf16.msra.mxu1 %v1495_v47 }
 0x1d4   : > { %1337 = vmatprep.subr.bf16.mxu1 %v1782_v0 }
 0x1d7   : > { %1338 = vmatpush3.bf16.msra.mxu1 %v1496_v48 }
 0x1d8   : > { %1339 = vmatprep.subr.bf16.mxu1 %v1782_v0 }
 0x1db   : > { %1340 = vmatpush3.bf16.msra.mxu1 %v1497_v49 }
 0x1dc   : > { %1341 = vmatprep.subr.bf16.mxu1 %v1782_v0 }
 0x1df   : > { %1342 = vmatpush3.bf16.msra.mxu1 %v1498_v63 }
 0x1e0   : > { %1343 = vmatprep.subr.bf16.mxu1 %v1782_v0 }
 0x1e3   : > { %1344 = vmatpush3.bf16.msra.mxu1 %v1499_v1 }
 0x1e4   : > { %1345 = vmatprep.subr.bf16.mxu1 %v1782_v0 }
 0x1e7   : > { %1346 = vmatpush3.bf16.msra.mxu1 %v1500_v2 }
 0x1e8   : > { %1347 = vmatprep.subr.bf16.mxu1 %v1782_v0  ;;  %v1224_v0 = vld [vmem:[%s2280_s11] ss:$0 sm:$0xff] }
 0x1eb   : > { %1348 = vmatpush3.bf16.msra.mxu1 %v1501_v3 }
 0x2a1   : > { %v752_v27 = vpop.f32.mrb[0].mxu1 }
 0x2a2   : > { %v753_v29 = vadd.f32 %v752_v27, %v669_v26  ;;  %v1311_v30 = vpop.f32.mrb[1].mxu1 }
 0x2a3   : > { %v755_v31 = vpop.f32.mrb[2].mxu1 }
 0x2a4   : > { %v1312_v32 = vpop.f32.mrb[3].mxu1  ;;  %v765_v33 = vadd.f32 %v1212_v28, %v753_v29 }
 0x2a6   : > { %766 = vadd.xlane.f32.xlu0 %v765_v33 }
 0x333   : > { %v767_v36 = vpop.xlane.xlu0 %766 }
 0x334   : > { %v768_v37 = vmul.f32 0.03125, %v767_v36 }
 0x336   : > { %v769_v38 = vsub.f32 %v765_v33, %v768_v37  ;;  %v773_v50 = vmul.f32 %v768_v37, %v768_v37 }
 0x338   : > { %v770_v39 = vmul.f32 %v769_v38, %v769_v38  ;;  %v774_v51 = vmul.f32 96.0, %v773_v50 }
 0x33a   : > { %771 = vadd.xlane.f32.xlu0 %v770_v39 }
 0x3c7   : > { %v772_v52 = vpop.xlane.xlu0 %771 }
 0x3c8   : > { %v775_v53 = vsub.f32 %v772_v52, %v774_v51 }
 0x3ca   : > { %v776_v54 = vmul.f32 0.03125, %v775_v53 }
 0x3cc   : > { %v777_v55 = vadd.f32 1e-12, %v776_v54 }
 0x3ce   : > { %1504 = vrsqrt.f32 %v777_v55 }
 0x3d8   : > { %v1505_v56 = vpop.eup %1504 }
 0x3d9   : > { %v779_v58 = vmul.f32 %v1505_v56, %v769_v38 }
 0x3db   : > { %v787_v60 = vmul.f32 %v1213_v57, %v779_v58 }
 0x3dd   : > { %v795_v61 = vadd.f32 %v1214_v59, %v787_v60 }
 0x3df   : > { %v796_v62 = vpack.c.bf16 %v795_v61, %v795_v61 }
 0x3e1   : > { %1330 = vmatmul.mubr.bf16.vlgmr.msra.gmra.mrb[4].mxu0 %v796_v62 }
 0x4b4   : > { %v902_v5 = vpop.f32.mrb[4].mxu0 }
 0x4b5   : > { %v903_v6 = vadd.f32 %v1215_v4, %v902_v5  ;;  %v1331_v7 = vpop.f32.mrb[5].mxu0 }
 0x4b6   : > { %v905_v8 = vpop.f32.mrb[6].mxu0 }
 0x4b7   : > { %1506 = vtanh.f32 %v903_v6  ;;  %v1332_v9 = vpop.f32.mrb[7].mxu0 }
 0x4c1   : > { %v1507_v10 = vpop.eup %1506 }
 0x4c2   : > { %v909_v11 = vpack.c.bf16 %v1507_v10, %v1507_v10 }
 0x4c4   : > { %1350 = vmatmul.mubr.bf16.vlgmr.msra.gmra.mrb[4].mxu1 %v909_v11 }
 0x597   : > { %v1015_v12 = vpop.f32.mrb[4].mxu1 }
 0x598   : > { %v1016_v13 = vadd.f32 %v1224_v0, %v1015_v12  ;;  %v1351_v14 = vpop.f32.mrb[5].mxu1 }
 0x599   : > { %v1018_v15 = vpop.f32.mrb[6].mxu1 }
 0x59a   : > { %1021 = vst [vmem:[%s534_s7] sm:$0xff] %v1016_v13  ;;  %v1352_v16 = vpop.f32.mrb[7].mxu1 }
 0x59b   : > { %1691 = shalt.err (!%p1688_p9)
}
 0x59c   : > { %s1692_s15 = scalar_lea.hbm %s2187_s12, 128  ;;  %s1696_s11 = scalar_lea.hbm %s2281_s13, 256 }
 0x59d   : > { %p1693_p1 = scmp.ne.s32.totalorder %s2187_s12, %s1692_s15  ;;  %p1697_p4 = scmp.lt.u32.totalorder %s2187_s12, %s2281_s13 }
 0x59e   : > { %p1698_p13 = scmp.lt.u32.totalorder %s1696_s11, %s1692_s15  ;;  %p1700_p2 = scmp.lt.u32.totalorder %s1692_s15, %s2187_s12 }
 0x59f   : > { %p1694_p3 = pnand %p1693_p1, %p2282_p5 }
 0x5a0   : > { %p1699_p6 = por %p1698_p13, %p1697_p4 }
 0x5a1   : > { %p1695_p10 = pneg %p1694_p3 }
 0x5a2   : > { %p1701_p7 = por %p1700_p2, %p1699_p6 }
 0x5a4   : > { %p1702_p11 = pnand %p1701_p7, %p1695_p10 }
 0x5a6   : > { %1705 = shalt.err (!%p1702_p11)
}
 0x5a7   : > { %1375 = dma.vmem_to_hbm [thread:$0]  (%p2282_p5), %s2189_s17, 128, %s2187_s12, %s1023_s6  }
 0x5a8 PF: > { %s1049_s18 = sand.u32 1, %s1752_s21   ;;  %p2283_p12 = scmp.ne.s32.totalorder %s2273_s30, 0 }
 0x5a9   : > { %p2284_p0 = scmp.ge.s32.totalorder %s1772_s26, 2  ;;  %s1050_s19 = scalar_lea.sflag [#allocation4], %s1049_s18 }
 0x5ab   : > { %p1398_p8 = pnand %p2284_p0, %p2283_p12 }
 0x5ad   : > { %1747 = dma.done.wait (!%p1398_p8), %s1050_s19, 128  }
 0x5ae   : > { %1749 = vsyncadd (!%p1398_p8), %s1050_s19, 4294967168  ;;  %s31_s26 = sadd.s32 1, %s1772_s26   ;;  %s2285_s21 = smov %s1756_s22 }
 0x5af   : > { %p28_p9 = scmp.ge.s32.totalorder %s31_s26, 4   ;;  %s2286_s22 = smov %s1760_s23 }
 0x5b0   : > { %s2287_s23 = smov %s2050_s27  ;;  %s2288_s24 = smov %s1768_s25 }
 0x5b1   : > { %s2289_s25 = smov %s2291_s14  ;;  %30 = sbr.rel (!%p28_p9) target bundleno = 17 (0x11), region = 137 }
 0x5b8   :  { %1055 = vsyncpa [#allocation3], 1 }
 0x5b9   :  { %1057 = vsyncpa [#allocation3 + $0x1], 1 }
 0x5ba   :  { %1058 = vsyncpa [#allocation6], 1 }
 0x5bb   :  { %1059 = vsyncpa [#allocation9], 1 }
 0x5bc   :  { %1060 = vsyncpa [#allocation12], 1 }
 0x5bd   :  { %1061 = vsyncpa [#allocation4], 1 }
 0x5be   :  { %1063 = vsyncpa [#allocation4 + $0x1], 1 }

// kernel: tpu_custom_call.1
= control target key start
LH: loop header
LB: loop body
LE: loop exit
PB: predicated region body
PF: predicated region fallthrough
CT: control target
= control target key end

     0   :  { %s2236_s0 = inlined_call_operand.hbm [shape: bf16[2,8,128], index: 0, kind: input, shape index: {}]   ;;  %s2237_s1 = inlined_call_operand.hbm [shape: f32[8,128], index: 1, kind: input, shape index: {}]   ;;  %s2238_s2 = inlined_call_operand.vmem [shape: f32[2,1,128], index: 2, kind: input, shape index: {}]   ;;  %s2239_s3 = inlined_call_operand.hbm [shape: bf16[128,128], index: 3, kind: input, shape index: {}]   ;;  %s2240_s4 = inlined_call_operand.vmem [shape: f32[1,128], index: 4, kind: input, shape index: {}]   ;;  %s2241_s5 = inlined_call_operand.hbm [shape: bf16[128,128], index: 5, kind: input, shape index: {}]   ;;  %s2242_s6 = inlined_call_operand.vmem [shape: f32[1,128], index: 6, kind: input, shape index: {}]   ;;  %s2243_s7 = inlined_call_operand.vmem [shape: f32[1,128], index: 7, kind: input, shape index: {}]   ;;  %s2244_s8 = inlined_call_operand.hbm [shape: bf16[128,128], index: 8, kind: input, shape index: {}]   ;;  %s2245_s9 = inlined_call_operand.vmem [shape: f32[1,128], index: 9, kind: input, shape index: {}]   ;;  %s2246_s10 = inlined_call_operand.hbm [shape: bf16[128,128], index: 10, kind: input, shape index: {}]   ;;  %s2247_s11 = inlined_call_operand.vmem [shape: f32[1,128], index: 11, kind: input, shape index: {}]   ;;  %s2248_s12 = inlined_call_operand.hbm [shape: f32[2,8,128], index: 12, kind: output, shape index: {}]  }
   0x1   :  { %2255 = sst [smem:[#allocation19_spill]] %s2237_s1 }
   0x2   :  { %2256 = sst [smem:[#allocation20_spill]] %s2241_s5 }
   0x3   :  { %2257 = sst [smem:[#allocation21_spill]] %s2242_s6 }
   0x4   :  { %2258 = sst [smem:[#allocation22_spill]] %s2243_s7 }
   0x5   :  { %2259 = sst [smem:[#allocation23_spill]] %s2245_s9 }
   0x6   :  { %2260 = sst [smem:[#allocation24_spill]] %s2247_s11 }
   0x7   :  { %2261 = sst [smem:[#allocation25_spill]] %s2248_s12 }
   0x8   :  { %17 = vsyncpa [#allocation3], 0 }
   0x9   :  { %19 = vsyncpa [#allocation3 + $0x1], 0 }
   0xa   :  { %20 = vsyncpa [#allocation6], 0 }
   0xb   :  { %21 = vsyncpa [#allocation9], 0 }
   0xc   :  { %22 = vsyncpa [#allocation12], 0 }
   0xd   :  { %23 = vsyncpa [#allocation4], 0 }
   0xe   :  { %25 = vsyncpa [#allocation4 + $0x1], 0  ;;  %s1850_s21 = smov 0   ;;  %s1852_s22 = smov 0  }
   0xf   :  { %s1854_s23 = smov 0   ;;  %s1856_s24 = smov 0  }
  0x10   :  { %s1858_s25 = smov 0   ;;  %s1860_s26 = smov 0  }
  0x11 LB: > { %s2249_s27 = sadd.s32 4294967295, %s1772_s26   ;;  %p1178_p0 = scmp.ge.s32.totalorder %s1772_s26, 1  ;;  %s1772_s26 = sphi %s1860_s26, %s31_s26   ;;  %s1768_s25 = sphi %s1858_s25, %s2289_s25   ;;  %s1764_s24 = sphi %s1856_s24, %s2288_s24   ;;  %s1760_s23 = sphi %s1854_s23, %s2287_s23   ;;  %s1756_s22 = sphi %s1852_s22, %s2286_s22   ;;  %s1752_s21 = sphi %s1850_s21, %s2285_s21  }
  0x12   : > { %p1884_p1 = scmp.eq.s32.totalorder %s2249_s27, 0  ;;  %p345_p2 = scmp.lt.s32.totalorder %s1772_s26, 3 }
  0x13   : > { %s1774_s30 = smov [#allocation5]   ;;  %s1775_s15 = smov [#allocation8]  }
  0x14   : > { %s2262_s28 = scalar_select %p1884_p1, 1, 0 }
  0x15   : > { %p1889_p3 = pnand %p1178_p0, %p345_p2  ;;  %s360_s13 = sshll.u32 %s1774_s30, 4  ;;  %s361_s13 = int_to_ptr.vmem [resolvable:$true] %s360_s13 }
  0x16   : > { %s386_s16 = sshll.u32 %s1775_s15, 4  ;;  %s1776_s17 = smov [#allocation7]   ;;  %s1902_s16 = int_to_ptr.vmem [resolvable:$true] %s386_s16 }
  0x17   : > { %s2263_s29 = scalar_select %p1889_p3, 1, 0 }
  0x18   : > { %p1377_p5 = pneg %p1889_p3  ;;  %s1904_s18 = sshll.u32 %s1776_s17, 4  ;;  %s371_s18 = int_to_ptr.vmem [resolvable:$true] %s1904_s18 }
  0x19   : > { %s2265_s1 = sld [smem:[#allocation19_spill]] }
  0x1a   : > { %p1898_p6 = pnand %p1377_p5, %p1884_p1 }
  0x1c   : > { %p1914_p8 = pneg %p1898_p6 }
  0x1f   : > { %s1508_s30 = scalar_lea.hbm %s2265_s1, 128 }
  0x20   : > { %p1509_p7 = scmp.ne.s32.totalorder %s2265_s1, %s1508_s30  ;;  %p1515_p11 = scmp.lt.u32.totalorder %s1508_s30, %s2265_s1 }
  0x22   : > { %p1511_p9 = pnand %p1914_p8, %p1509_p7 }
  0x24   : > { %p1512_p10 = pneg %p1511_p9 }
  0x26   : > { %p1517_p12 = pnand %p1515_p11, %p1512_p10 }
  0x28   : > { %1520 = shalt.err (!%p1517_p12)
}
  0x29   : > { %s1521_s19 = scalar_lea.vmem %s361_s13, 128  ;;  %p1529_p5 = scmp.lt.s32.totalorder %s361_s13, %s361_s13 }
  0x2a   : > { %p1522_p13 = scmp.ne.s32.totalorder %s361_s13, %s1521_s19  ;;  %p1530_p4 = scmp.lt.s32.totalorder %s1521_s19, %s1521_s19 }
  0x2c   : > { %p1524_p0 = pnand %p1522_p13, %p1914_p8  ;;  %p1531_p3 = por %p1530_p4, %p1529_p5 }
  0x2e   : > { %p1525_p2 = pneg %p1524_p0 }
  0x30   : > { %p1532_p1 = pnand %p1531_p3, %p1525_p2 }
  0x32   : > { %1535 = shalt.err (!%p1532_p1)
}
  0x33   : > { %1380 = dma.hbm_to_vmem [thread:$0]  (!%p1898_p6), %s2265_s1, 128, %s361_s13, [#allocation6]  }
  0x34   : > { %s2267_s5 = sld [smem:[#allocation20_spill]] }
  0x3a   : > { %s1536_s15 = scalar_lea.hbm %s2267_s5, 1024 }
  0x3b   : > { %p1537_p7 = scmp.ne.s32.totalorder %s2267_s5, %s1536_s15  ;;  %p1543_p1 = scmp.lt.u32.totalorder %s1536_s15, %s2267_s5 }
  0x3d   : > { %p1539_p9 = pnand %p1537_p7, %p1914_p8 }
  0x3f   : > { %p1540_p4 = pneg %p1539_p9 }
  0x41   : > { %p1545_p3 = pnand %p1543_p1, %p1540_p4 }
  0x43   : > { %1548 = shalt.err (!%p1545_p3)
}
  0x44   : > { %s1549_s13 = scalar_lea.vmem %s1902_s16, 1024  ;;  %p1557_p13 = scmp.lt.s32.totalorder %s1902_s16, %s1902_s16 }
  0x45   : > { %p1550_p10 = scmp.ne.s32.totalorder %s1902_s16, %s1549_s13  ;;  %p1558_p0 = scmp.lt.s32.totalorder %s1549_s13, %s1549_s13 }
  0x47   : > { %p1552_p11 = pnand %p1550_p10, %p1914_p8  ;;  %p1559_p2 = por %p1558_p0, %p1557_p13 }
  0x49   : > { %p1553_p12 = pneg %p1552_p11 }
  0x4b   : > { %p1560_p5 = pnand %p1559_p2, %p1553_p12 }
  0x4d   : > { %1563 = shalt.err (!%p1560_p5)
}
  0x4e   : > { %s1777_s9 = smov 64   ;;  %s1778_s7 = smov 4  }
  0x4f   : > { %1386 = dma.hbm_to_vmem [thread:$0]  (!%p1898_p6), %s2267_s5, 1024, %s1902_s16, [#allocation9], %s1777_s9, %s1777_s9, %s1778_s7  }
  0x50   : > { %s1564_s15 = scalar_lea.hbm %s2239_s3, 1024 }
  0x51   : > { %p1565_p7 = scmp.ne.s32.totalorder %s2239_s3, %s1564_s15  ;;  %p1571_p1 = scmp.lt.u32.totalorder %s1564_s15, %s2239_s3 }
  0x53   : > { %p1567_p9 = pnand %p1565_p7, %p1914_p8 }
  0x55   : > { %p1568_p4 = pneg %p1567_p9 }
  0x57   : > { %p1573_p3 = pnand %p1571_p1, %p1568_p4 }
  0x59   : > { %1576 = shalt.err (!%p1573_p3)
}
  0x5a   : > { %s1577_s12 = scalar_lea.vmem %s371_s18, 1024  ;;  %p1585_p13 = scmp.lt.s32.totalorder %s371_s18, %s371_s18 }
  0x5b   : > { %p1578_p10 = scmp.ne.s32.totalorder %s371_s18, %s1577_s12  ;;  %p1586_p0 = scmp.lt.s32.totalorder %s1577_s12, %s1577_s12 }
  0x5d   : > { %p1580_p11 = pnand %p1578_p10, %p1914_p8  ;;  %p1587_p2 = por %p1586_p0, %p1585_p13 }
  0x5f   : > { %p1581_p12 = pneg %p1580_p11 }
  0x61   : > { %p1588_p5 = pnand %p1587_p2, %p1581_p12 }
  0x63   : > { %1591 = shalt.err (!%p1588_p5)
}
  0x64   : > { %1383 = dma.hbm_to_vmem [thread:$0]  (!%p1898_p6), %s2239_s3, 1024, %s371_s18, [#allocation6], %s1777_s9, %s1777_s9, %s1778_s7  }
  0x65   : > { %s1779_s27 = smov [#allocation10]   ;;  %s1780_s30 = smov [#allocation11]  }
  0x66   : > { %s405_s20 = sshll.u32 %s1779_s27, 4  ;;  %s421_s15 = sshll.u32 %s1780_s30, 4  ;;  %s406_s20 = int_to_ptr.vmem [resolvable:$true] %s405_s20  ;;  %s422_s15 = int_to_ptr.vmem [resolvable:$true] %s421_s15 }
  0x67   : > { %s1592_s13 = scalar_lea.hbm %s2244_s8, 1024 }
  0x68   : > { %p1593_p7 = scmp.ne.s32.totalorder %s2244_s8, %s1592_s13  ;;  %p1599_p1 = scmp.lt.u32.totalorder %s1592_s13, %s2244_s8 }
  0x6a   : > { %p1595_p9 = pnand %p1593_p7, %p1914_p8 }
  0x6c   : > { %p1596_p4 = pneg %p1595_p9 }
  0x6e   : > { %p1601_p3 = pnand %p1599_p1, %p1596_p4 }
  0x70   : > { %1604 = shalt.err (!%p1601_p3)
}
  0x71   : > { %s1605_s18 = scalar_lea.vmem %s406_s20, 1024  ;;  %p1613_p13 = scmp.lt.s32.totalorder %s406_s20, %s406_s20 }
  0x72   : > { %p1606_p10 = scmp.ne.s32.totalorder %s406_s20, %s1605_s18  ;;  %p1614_p0 = scmp.lt.s32.totalorder %s1605_s18, %s1605_s18 }
  0x74   : > { %p1608_p11 = pnand %p1606_p10, %p1914_p8  ;;  %p1615_p2 = por %p1614_p0, %p1613_p13 }
  0x76   : > { %p1609_p12 = pneg %p1608_p11 }
  0x78   : > { %p1616_p5 = pnand %p1615_p2, %p1609_p12 }
  0x7a   : > { %1619 = shalt.err (!%p1616_p5)
}
  0x7b   : > { %1389 = dma.hbm_to_vmem [thread:$0]  (!%p1898_p6), %s2244_s8, 1024, %s406_s20, [#allocation9], %s1777_s9, %s1777_s9, %s1778_s7  }
  0x7c   : > { %s1620_s30 = scalar_lea.hbm %s2246_s10, 1024 }
  0x7d   : > { %p1621_p7 = scmp.ne.s32.totalorder %s2246_s10, %s1620_s30  ;;  %p1627_p1 = scmp.lt.u32.totalorder %s1620_s30, %s2246_s10 }
  0x7f   : > { %p1623_p9 = pnand %p1621_p7, %p1914_p8 }
  0x81   : > { %p1624_p4 = pneg %p1623_p9 }
  0x83   : > { %p1629_p3 = pnand %p1627_p1, %p1624_p4 }
  0x85   : > { %1632 = shalt.err (!%p1629_p3)
}
  0x86   : > { %s1633_s1 = scalar_lea.vmem %s422_s15, 1024  ;;  %p1641_p13 = scmp.lt.s32.totalorder %s422_s15, %s422_s15 }
  0x87   : > { %p1634_p10 = scmp.ne.s32.totalorder %s422_s15, %s1633_s1  ;;  %p1642_p0 = scmp.lt.s32.totalorder %s1633_s1, %s1633_s1 }
  0x89   : > { %p1636_p11 = pnand %p1634_p10, %p1914_p8  ;;  %p1643_p2 = por %p1642_p0, %p1641_p13 }
  0x8b   : > { %p1637_p12 = pneg %p1636_p11 }
  0x8d   : > { %p1644_p5 = pnand %p1643_p2, %p1637_p12 }
  0x8f   : > { %1647 = shalt.err (!%p1644_p5)
}
  0x90   : > { %1392 = dma.hbm_to_vmem [thread:$0]  (!%p1898_p6), %s2246_s10, 1024, %s422_s15, [#allocation12], %s1777_s9, %s1777_s9, %s1778_s7  }
  0x91   : > { %s1177_s11 = sadd.s32 4294967294, %s1772_s26   ;;  %s40_s14 = sadd.s32 1, %s1768_s25 }
  0x92   : > { %s52_s5 = sadd.s32 1, %s1760_s23  ;;  %p41_p8 = scmp.ge.s32.totalorder %s40_s14, 2 }
  0x93   : > { %p59_p7 = scmp.ne.s32.totalorder %s1760_s23, %s1756_s22  ;;  %p60_p9 = scmp.eq.s32.totalorder %s1772_s26, 0 }
  0x94   : > { %p65_p4 = scmp.ne.s32.totalorder %s1756_s22, %s1752_s21  ;;  %s2291_s14 = smov (%p41_p8, %s40_s14), 0 }
  0x95   : > { %p2030_p1 = por %p60_p9, %p59_p7  ;;  %p2269_p3 = scmp.ne.s32.totalorder %s2262_s28, 0 }
  0x96   : > { %s47_s7 = ssub.s32 %s1768_s25, %s2291_s14  ;;  %s2271_s15 = sadd.s32 4294967295, %s1772_s26  }
  0x97   : > { %p2036_p6 = por %p2269_p3, %p65_p4  ;;  %p332_p10 = scmp.eq.s32.totalorder %s2271_s15, 1 }
  0x98   : > { %p50_p11 = scmp.eq.s32.totalorder %s47_s7, 0  ;;  %p338_p12 = scmp.eq.s32.totalorder %s1177_s11, 1 }
  0x99   : > { %p2044_p13 = por %p332_p10, %p59_p7  ;;  %p1406_p0 = scmp.lt.s32.totalorder %s1772_s26, 2 }
  0x9a   : > { %s2050_s27 = scalar_select %p50_p11, %s1760_s23, %s52_s5  }
  0x9b   : > { %s2272_s16 = scalar_select %p2044_p13, 1, 0 }
  0x9c   : > { %p2052_p2 = por %p338_p12, %p65_p4  ;;  %s438_s17 = sand.u32 1, %s1760_s23  }
  0x9d   : > { %s1185_s19 = sshll.u32 %s438_s17, 2  ;;  %s1186_s13 = sshll.u32 %s1768_s25, 6 }
  0x9e   : > { %s2273_s30 = scalar_select %p2052_p2, 1, 0 }
  0x9f   : > { %s2061_s20 = scalar_lea.hbm %s2236_s0, %s1186_s13  ;;  %s442_s18 = scalar_lea.vmem [#allocation2], %s1185_s19 }
  0xa0   : > { %s450_s11 = sshll.u32 %s442_s18, 4  ;;  %p2067_p5 = pnand %p1406_p0, %p2030_p1  ;;  %s2063_s11 = int_to_ptr.vmem [resolvable:$true] %s450_s11 }
  0xa1   : > { %s439_s7 = scalar_lea.sflag [#allocation3], %s438_s17  ;;  %s1648_s15 = scalar_lea.hbm %s2061_s20, 64 }
  0xa2   : > { %p1649_p8 = scmp.ne.s32.totalorder %s2061_s20, %s1648_s15  ;;  %p1650_p7 = pneg %p2067_p5 }
  0xa3   : > { %s1653_s12 = scalar_lea.hbm %s2236_s0, 128  ;;  %p1654_p1 = scmp.lt.u32.totalorder %s2061_s20, %s2236_s0 }
  0xa4   : > { %p1651_p9 = pnand %p1650_p7, %p1649_p8  ;;  %p1655_p3 = scmp.lt.u32.totalorder %s1653_s12, %s1648_s15 }
  0xa5   : > { %p1657_p11 = scmp.lt.u32.totalorder %s1648_s15, %s2061_s20 }
  0xa6   : > { %p1652_p4 = pneg %p1651_p9  ;;  %p1656_p10 = por %p1655_p3, %p1654_p1 }
  0xa8   : > { %p1658_p12 = por %p1657_p11, %p1656_p10 }
  0xaa   : > { %p1659_p0 = pnand %p1658_p12, %p1652_p4 }
  0xac   : > { %1662 = shalt.err (!%p1659_p0)
}
  0xad   : > { %s1663_s17 = scalar_lea.vmem %s2063_s11, 64  ;;  %s1781_s18 = smov [#allocation2]  }
  0xae   : > { %p1664_p8 = scmp.ne.s32.totalorder %s2063_s11, %s1663_s17  ;;  %s1668_s19 = sshll.u32 %s1781_s18, 4  ;;  %s1669_s19 = int_to_ptr.vmem [resolvable:$false] %s1668_s19 }
  0xaf   : > { %s1670_s13 = scalar_lea.vmem %s1669_s19, 128  ;;  %p1671_p13 = scmp.lt.s32.totalorder %s2063_s11, %s1669_s19 }
  0xb0   : > { %p1666_p9 = pnand %p1664_p8, %p1650_p7  ;;  %p1672_p1 = scmp.lt.s32.totalorder %s1670_s13, %s1663_s17 }
  0xb2   : > { %p1667_p2 = pneg %p1666_p9  ;;  %p1673_p3 = por %p1672_p1, %p1671_p13 }
  0xb4   : > { %p1674_p10 = pnand %p1673_p3, %p1667_p2 }
  0xb6   : > { %1677 = shalt.err (!%p1674_p10)
}
  0xb7   : > { %1396 = dma.hbm_to_vmem [thread:$0]  (!%p2067_p5), %s2061_s20, 64, %s2063_s11, %s439_s7  }
  0xb8   : > { %p2275_p4 = scmp.ne.s32.totalorder %s2263_s29, 0 }
  0xb9   : > { %s2099_s15 = sand.u32 (!%p2275_p4), 1, %s1756_s22  }
  0xba   : > { %465 = sbr.rel (%p2275_p4) target bundleno = 1448 (0x5a8), region = 68  ;;  %s1188_s12 = sshll.u32 (!%p2275_p4), %s2099_s15, 2 }
  0xbb   : > { %s468_s6 = scalar_lea.sflag (!%p2275_p4), [#allocation3], %s2099_s15  ;;  %s2103_s1 = scalar_lea.vmem (!%p2275_p4), [#allocation2], %s1188_s12 }
  0xc1   : > { %1731 = dma.done.wait (%p2036_p6), %s468_s6, 64  }
  0xc2   : > { %1733 = vsyncadd (%p2036_p6), %s468_s6, 4294967232  ;;  %p2276_p13 = scmp.ne.s32.totalorder %s2262_s28, 0 }
  0xc4   : > { %1735 = dma.done.wait (%p2276_p13), [#allocation6], 1152  }
  0xc5   : > { %1737 = vsyncadd (%p2276_p13), [#allocation6], 4294966144 }
  0xc6   : > { %1739 = dma.done.wait (%p2276_p13), [#allocation9], 2048  }
  0xc7   : > { %1741 = vsyncadd (%p2276_p13), [#allocation9], 4294965248 }
  0xc8   : > { %1743 = dma.done.wait (%p2276_p13), [#allocation12], 1024  }
  0xc9   : > { %1745 = vsyncadd (%p2276_p13), [#allocation12], 4294966272  ;;  %v1782_v0 = vmov 0.0   ;;  %vm1783_vm0 = vmmov 0   ;;  %v1470_v1 = vld [vmem:[#allocation7] sm:$0xff]   ;;  %v1471_v2 = vld [vmem:[#allocation7 + $0x8] sm:$0xff]  }
  0xca   : > { %1273 = vmatprep.subr.bf16.mxu0 %v1782_v0  ;;  %1289 = vmatprep.mubr.msk.bf16.mxu0 %vm1783_vm0, %v1782_v0  ;;  %v1472_v3 = vld [vmem:[#allocation7 + $0x10] sm:$0xff]   ;;  %v1478_v4 = vld [vmem:[#allocation8] sm:$0xff]   ;;  %v1473_v5 = vld [vmem:[#allocation7 + $0x18] sm:$0xff]   ;;  %p535_p6 = scmp.lt.s32.totalorder %s1764_s24, 1  ;;  %s2277_s18 = sld [smem:[#allocation21_spill]] }
  0xcb   : > { %1293 = vmatprep.subr.bf16.mxu1 %v1782_v0  ;;  %1309 = vmatprep.mubr.msk.bf16.mxu1 %vm1783_vm0, %v1782_v0  ;;  %v1479_v6 = vld [vmem:[#allocation8 + $0x8] sm:$0xff]   ;;  %v1474_v7 = vld [vmem:[#allocation7 + $0x20] sm:$0xff]   ;;  %v1480_v8 = vld [vmem:[#allocation8 + $0x10] sm:$0xff]   ;;  %s2278_s12 = sld [smem:[#allocation22_spill]]  ;;  %s2279_s28 = sld [smem:[#allocation23_spill]] }
  0xcc   : > { %1274 = vmatpush3.bf16.msra.mxu0 %v1470_v1  ;;  %1294 = vmatpush3.bf16.msra.mxu1 %v1478_v4  ;;  %v1475_v9 = vld [vmem:[#allocation7 + $0x28] sm:$0xff]   ;;  %v1481_v10 = vld [vmem:[#allocation8 + $0x18] sm:$0xff]   ;;  %v1476_v11 = vld [vmem:[#allocation7 + $0x30] sm:$0xff]   ;;  %s536_s9 = scalar_select %p535_p6, %s1764_s24, 1 }
  0xcd   : > { %1275 = vmatprep.subr.bf16.mxu0 %v1782_v0  ;;  %1295 = vmatprep.subr.bf16.mxu1 %v1782_v0  ;;  %v1477_v12 = vld [vmem:[#allocation7 + $0x38] sm:$0xff]   ;;  %v539_v13 = vld [vmem:[%s2103_s1] sm:$0xf]  ;;  %v1482_v14 = vld [vmem:[#allocation8 + $0x20] sm:$0xff]   ;;  %s1194_s29 = sshll.u32 %s2099_s15, 3  ;;  %s2280_s11 = sld [smem:[#allocation24_spill]] }
  0xce   : > { %v1483_v15 = vld [vmem:[#allocation8 + $0x28] sm:$0xff]   ;;  %v1484_v16 = vld [vmem:[#allocation8 + $0x30] sm:$0xff]   ;;  %v1485_v17 = vld [vmem:[#allocation8 + $0x38] sm:$0xff]   ;;  %s537_s5 = scalar_lea.vmem %s2238_s2, %s536_s9  ;;  %s534_s7 = scalar_lea.vmem [#allocation13], %s1194_s29 }
  0xcf   : > { %v1195_v18 = vld [vmem:[%s2240_s4] ss:$0 sm:$0xff]  ;;  %v669_v26 = vld [vmem:[#allocation5] sm:$0xff]  ;;  %v1486_v34 = vld [vmem:[#allocation10] sm:$0xff]   ;;  %s1037_s17 = sshll.u32 %s534_s7, 4  ;;  %s2281_s13 = sld [smem:[#allocation25_spill]]  ;;  %s2189_s17 = int_to_ptr.vmem [resolvable:$true] %s1037_s17 }
  0xd0   : > { %1276 = vmatpush3.bf16.msra.mxu0 %v1471_v2  ;;  %1296 = vmatpush3.bf16.msra.mxu1 %v1479_v6  ;;  %v1212_v28 = vld [vmem:[%s537_s5] ss:$0 sm:$0xff]  ;;  %v1487_v35 = vld [vmem:[#allocation10 + $0x8] sm:$0xff]   ;;  %v1489_v41 = vld [vmem:[#allocation10 + $0x18] sm:$0xff]   ;;  %s1234_s5 = sshll.u32 %s1764_s24, 7  ;;  %s1023_s6 = scalar_lea.sflag [#allocation4], %s2099_s15 }
  0xd1   : > { %1277 = vmatprep.subr.bf16.mxu0 %v1782_v0  ;;  %1297 = vmatprep.subr.bf16.mxu1 %v1782_v0  ;;  %v1488_v40 = vld [vmem:[#allocation10 + $0x10] sm:$0xff]   ;;  %v1490_v42 = vld [vmem:[#allocation10 + $0x20] sm:$0xff]   ;;  %v1491_v43 = vld [vmem:[#allocation10 + $0x28] sm:$0xff]   ;;  %s1678_s24 = scalar_lea.vmem %s2189_s17, 128  ;;  %p2282_p5 = scmp.ne.s32.totalorder %s2272_s16, 0 }
  0xd2   : > { %v1492_v44 = vld [vmem:[#allocation10 + $0x30] sm:$0xff]   ;;  %v1493_v45 = vld [vmem:[#allocation10 + $0x38] sm:$0xff]   ;;  %v1494_v46 = vld [vmem:[#allocation11] sm:$0xff]   ;;  %p1679_p2 = scmp.ne.s32.totalorder %s2189_s17, %s1678_s24  ;;  %s1784_s1 = smov [#allocation13]  }
  0xd3   : > { %v1495_v47 = vld [vmem:[#allocation11 + $0x8] sm:$0xff]   ;;  %v1496_v48 = vld [vmem:[#allocation11 + $0x10] sm:$0xff]   ;;  %v1497_v49 = vld [vmem:[#allocation11 + $0x18] sm:$0xff]  }
  0xd4   : > { %1278 = vmatpush3.bf16.msra.mxu0 %v1472_v3  ;;  %1298 = vmatpush3.bf16.msra.mxu1 %v1480_v8  ;;  %v1213_v57 = vld [vmem:[%s2277_s18] ss:$0 sm:$0xff]  ;;  %v1498_v63 = vld [vmem:[#allocation11 + $0x20] sm:$0xff]   ;;  %v1499_v1 = vld [vmem:[#allocation11 + $0x28] sm:$0xff]   ;;  %p1680_p7 = pnand %p1679_p2, %p2282_p5 }
  0xd5   : > { %1279 = vmatprep.subr.bf16.mxu0 %v1782_v0  ;;  %1299 = vmatprep.subr.bf16.mxu1 %v1782_v0  ;;  %v1214_v59 = vld [vmem:[%s2278_s12] ss:$0 sm:$0xff]  ;;  %v1501_v3 = vld [vmem:[#allocation11 + $0x38] sm:$0xff]   ;;  %s2187_s12 = scalar_lea.hbm %s2281_s13, %s1234_s5 }
  0xd6   : > { %v1500_v2 = vld [vmem:[#allocation11 + $0x30] sm:$0xff]   ;;  %p1681_p11 = pneg %p1680_p7 }
  0xd7   : > { %v1215_v4 = vld [vmem:[%s2279_s28] ss:$0 sm:$0xff]  ;;  %s1682_s28 = sshll.u32 %s1784_s1, 4  ;;  %s1683_s28 = int_to_ptr.vmem [resolvable:$false] %s1682_s28 }
  0xd8   : > { %1280 = vmatpush3.bf16.msra.mxu0 %v1473_v5  ;;  %1300 = vmatpush3.bf16.msra.mxu1 %v1481_v10  ;;  %s1684_s29 = scalar_lea.vmem %s1683_s28, 256  ;;  %p1685_p12 = scmp.lt.s32.totalorder %s2189_s17, %s1683_s28 }
  0xd9   : > { %1281 = vmatprep.subr.bf16.mxu0 %v1782_v0  ;;  %1301 = vmatprep.subr.bf16.mxu1 %v1782_v0  ;;  %p1686_p0 = scmp.lt.s32.totalorder %s1684_s29, %s1678_s24 }
  0xdb   : > { %p1687_p8 = por %p1686_p0, %p1685_p12 }
  0xdc   : > { %1282 = vmatpush3.bf16.msra.mxu0 %v1474_v7  ;;  %1302 = vmatpush3.bf16.msra.mxu1 %v1482_v14 }
  0xdd   : > { %1283 = vmatprep.subr.bf16.mxu0 %v1782_v0  ;;  %1303 = vmatprep.subr.bf16.mxu1 %v1782_v0  ;;  %p1688_p9 = pnand %p1687_p8, %p1681_p11 }
  0xe0   : > { %1284 = vmatpush3.bf16.msra.mxu0 %v1475_v9  ;;  %1304 = vmatpush3.bf16.msra.mxu1 %v1483_v15 }
  0xe1   : > { %1285 = vmatprep.subr.bf16.mxu0 %v1782_v0  ;;  %1305 = vmatprep.subr.bf16.mxu1 %v1782_v0 }
  0xe4   : > { %1286 = vmatpush3.bf16.msra.mxu0 %v1476_v11  ;;  %1306 = vmatpush3.bf16.msra.mxu1 %v1484_v16 }
  0xe5   : > { %1287 = vmatprep.subr.bf16.mxu0 %v1782_v0  ;;  %1307 = vmatprep.subr.bf16.mxu1 %v1782_v0 }
  0xe8   : > { %1288 = vmatpush3.bf16.msra.mxu0 %v1477_v12  ;;  %1308 = vmatpush3.bf16.msra.mxu1 %v1485_v17 }
  0xe9   : > { %1313 = vmatprep.subr.bf16.mxu0 %v1782_v0  ;;  %1333 = vmatprep.subr.bf16.mxu1 %v1782_v0 }
  0xeb   : > { %1290 = vmatmul.mubr.bf16.vlgmr.msra.gmra.mrb[0].mxu0 %v539_v13 }
  0xec   : > { %1329 = vmatprep.mubr.msk.bf16.mxu0 %vm1783_vm0, %v1782_v0  ;;  %1314 = vmatpush3.bf16.msra.mxu0 %v1486_v34 }
  0xed   : > { %1315 = vmatprep.subr.bf16.mxu0 %v1782_v0 }
  0xf0   : > { %1316 = vmatpush3.bf16.msra.mxu0 %v1487_v35 }
  0xf1   : > { %1317 = vmatprep.subr.bf16.mxu0 %v1782_v0 }
  0xf4   : > { %1318 = vmatpush3.bf16.msra.mxu0 %v1488_v40 }
  0xf5   : > { %1319 = vmatprep.subr.bf16.mxu0 %v1782_v0 }
  0xf8   : > { %1320 = vmatpush3.bf16.msra.mxu0 %v1489_v41 }
  0xf9   : > { %1321 = vmatprep.subr.bf16.mxu0 %v1782_v0 }
  0xfc   : > { %1322 = vmatpush3.bf16.msra.mxu0 %v1490_v42 }
  0xfd   : > { %1323 = vmatprep.subr.bf16.mxu0 %v1782_v0 }
 0x100   : > { %1324 = vmatpush3.bf16.msra.mxu0 %v1491_v43 }
 0x101   : > { %1325 = vmatprep.subr.bf16.mxu0 %v1782_v0 }
 0x104   : > { %1326 = vmatpush3.bf16.msra.mxu0 %v1492_v44 }
 0x105   : > { %1327 = vmatprep.subr.bf16.mxu0 %v1782_v0 }
 0x108   : > { %1328 = vmatpush3.bf16.msra.mxu0 %v1493_v45 }
 0x1be   : > { %v645_v19 = vpop.f32.mrb[0].mxu0 }
 0x1bf   : > { %v646_v20 = vadd.f32 %v1195_v18, %v645_v19  ;;  %v1291_v21 = vpop.f32.mrb[1].mxu0 }
 0x1c0   : > { %v648_v22 = vpop.f32.mrb[2].mxu0 }
 0x1c1   : > { %1502 = vtanh.f32 %v646_v20  ;;  %v1292_v23 = vpop.f32.mrb[3].mxu0 }
 0x1cb   : > { %v1503_v24 = vpop.eup %1502 }
 0x1cc   : > { %v652_v25 = vpack.c.bf16 %v1503_v24, %v1503_v24 }
 0x1ce   : > { %1310 = vmatmul.mubr.bf16.vlgmr.msra.gmra.mrb[0].mxu1 %v652_v25 }
 0x1cf   : > { %1349 = vmatprep.mubr.msk.bf16.mxu1 %vm1783_vm0, %v1782_v0  ;;  %1334 = vmatpush3.bf16.msra.mxu1 %v1494_v46 }
 0x1d0   : > { %1335 = vmatprep.subr.bf16.mxu1 %v1782_v0 }
 0x1d3   : > { %1336 = vmatpush3.bf16.msra.mxu1 %v1495_v47 }
 0x1d4   : > { %1337 = vmatprep.subr.bf16.mxu1 %v1782_v0 }
 0x1d7   : > { %1338 = vmatpush3.bf16.msra.mxu1 %v1496_v48 }
 0x1d8   : > { %1339 = vmatprep.subr.bf16.mxu1 %v1782_v0 }
 0x1db   : > { %1340 = vmatpush3.bf16.msra.mxu1 %v1497_v49 }
 0x1dc   : > { %1341 = vmatprep.subr.bf16.mxu1 %v1782_v0 }
 0x1df   : > { %1342 = vmatpush3.bf16.msra.mxu1 %v1498_v63 }
 0x1e0   : > { %1343 = vmatprep.subr.bf16.mxu1 %v1782_v0 }
 0x1e3   : > { %1344 = vmatpush3.bf16.msra.mxu1 %v1499_v1 }
 0x1e4   : > { %1345 = vmatprep.subr.bf16.mxu1 %v1782_v0 }
 0x1e7   : > { %1346 = vmatpush3.bf16.msra.mxu1 %v1500_v2 }
 0x1e8   : > { %1347 = vmatprep.subr.bf16.mxu1 %v1782_v0  ;;  %v1224_v0 = vld [vmem:[%s2280_s11] ss:$0 sm:$0xff] }
 0x1eb   : > { %1348 = vmatpush3.bf16.msra.mxu1 %v1501_v3 }
 0x2a1   : > { %v752_v27 = vpop.f32.mrb[0].mxu1 }
 0x2a2   : > { %v753_v29 = vadd.f32 %v752_v27, %v669_v26  ;;  %v1311_v30 = vpop.f32.mrb[1].mxu1 }
 0x2a3   : > { %v755_v31 = vpop.f32.mrb[2].mxu1 }
 0x2a4   : > { %v1312_v32 = vpop.f32.mrb[3].mxu1  ;;  %v765_v33 = vadd.f32 %v1212_v28, %v753_v29 }
 0x2a6   : > { %766 = vadd.xlane.f32.xlu0 %v765_v33 }
 0x333   : > { %v767_v36 = vpop.xlane.xlu0 %766 }
 0x334   : > { %v768_v37 = vmul.f32 0.03125, %v767_v36 }
 0x336   : > { %v769_v38 = vsub.f32 %v765_v33, %v768_v37  ;;  %v773_v50 = vmul.f32 %v768_v37, %v768_v37 }
 0x338   : > { %v770_v39 = vmul.f32 %v769_v38, %v769_v38  ;;  %v774_v51 = vmul.f32 96.0, %v773_v50 }
 0x33a   : > { %771 = vadd.xlane.f32.xlu0 %v770_v39 }
 0x3c7   : > { %v772_v52 = vpop.xlane.xlu0 %771 }
 0x3c8   : > { %v775_v53 = vsub.f32 %v772_v52, %v774_v51 }
 0x3ca   : > { %v776_v54 = vmul.f32 0.03125, %v775_v53 }
 0x3cc   : > { %v777_v55 = vadd.f32 1e-12, %v776_v54 }
 0x3ce   : > { %1504 = vrsqrt.f32 %v777_v55 }
 0x3d8   : > { %v1505_v56 = vpop.eup %1504 }
 0x3d9   : > { %v779_v58 = vmul.f32 %v1505_v56, %v769_v38 }
 0x3db   : > { %v787_v60 = vmul.f32 %v1213_v57, %v779_v58 }
 0x3dd   : > { %v795_v61 = vadd.f32 %v1214_v59, %v787_v60 }
 0x3df   : > { %v796_v62 = vpack.c.bf16 %v795_v61, %v795_v61 }
 0x3e1   : > { %1330 = vmatmul.mubr.bf16.vlgmr.msra.gmra.mrb[4].mxu0 %v796_v62 }
 0x4b4   : > { %v902_v5 = vpop.f32.mrb[4].mxu0 }
 0x4b5   : > { %v903_v6 = vadd.f32 %v1215_v4, %v902_v5  ;;  %v1331_v7 = vpop.f32.mrb[5].mxu0 }
 0x4b6   : > { %v905_v8 = vpop.f32.mrb[6].mxu0 }
 0x4b7   : > { %1506 = vtanh.f32 %v903_v6  ;;  %v1332_v9 = vpop.f32.mrb[7].mxu0 }
 0x4c1   : > { %v1507_v10 = vpop.eup %1506 }
 0x4c2   : > { %v909_v11 = vpack.c.bf16 %v1507_v10, %v1507_v10 }
 0x4c4   : > { %1350 = vmatmul.mubr.bf16.vlgmr.msra.gmra.mrb[4].mxu1 %v909_v11 }
 0x597   : > { %v1015_v12 = vpop.f32.mrb[4].mxu1 }
 0x598   : > { %v1016_v13 = vadd.f32 %v1224_v0, %v1015_v12  ;;  %v1351_v14 = vpop.f32.mrb[5].mxu1 }
 0x599   : > { %v1018_v15 = vpop.f32.mrb[6].mxu1 }
 0x59a   : > { %1021 = vst [vmem:[%s534_s7] sm:$0xff] %v1016_v13  ;;  %v1352_v16 = vpop.f32.mrb[7].mxu1 }
 0x59b   : > { %1691 = shalt.err (!%p1688_p9)
}
 0x59c   : > { %s1692_s15 = scalar_lea.hbm %s2187_s12, 128  ;;  %s1696_s11 = scalar_lea.hbm %s2281_s13, 256 }
 0x59d   : > { %p1693_p1 = scmp.ne.s32.totalorder %s2187_s12, %s1692_s15  ;;  %p1697_p4 = scmp.lt.u32.totalorder %s2187_s12, %s2281_s13 }
 0x59e   : > { %p1698_p13 = scmp.lt.u32.totalorder %s1696_s11, %s1692_s15  ;;  %p1700_p2 = scmp.lt.u32.totalorder %s1692_s15, %s2187_s12 }
 0x59f   : > { %p1694_p3 = pnand %p1693_p1, %p2282_p5 }
 0x5a0   : > { %p1699_p6 = por %p1698_p13, %p1697_p4 }
 0x5a1   : > { %p1695_p10 = pneg %p1694_p3 }
 0x5a2   : > { %p1701_p7 = por %p1700_p2, %p1699_p6 }
 0x5a4   : > { %p1702_p11 = pnand %p1701_p7, %p1695_p10 }
 0x5a6   : > { %1705 = shalt.err (!%p1702_p11)
}
 0x5a7   : > { %1375 = dma.vmem_to_hbm [thread:$0]  (%p2282_p5), %s2189_s17, 128, %s2187_s12, %s1023_s6  }
 0x5a8 PF: > { %s1049_s18 = sand.u32 1, %s1752_s21   ;;  %p2283_p12 = scmp.ne.s32.totalorder %s2273_s30, 0 }
 0x5a9   : > { %p2284_p0 = scmp.ge.s32.totalorder %s1772_s26, 2  ;;  %s1050_s19 = scalar_lea.sflag [#allocation4], %s1049_s18 }
 0x5ab   : > { %p1398_p8 = pnand %p2284_p0, %p2283_p12 }
 0x5ad   : > { %1747 = dma.done.wait (!%p1398_p8), %s1050_s19, 128  }
 0x5ae   : > { %1749 = vsyncadd (!%p1398_p8), %s1050_s19, 4294967168  ;;  %s31_s26 = sadd.s32 1, %s1772_s26   ;;  %s2285_s21 = smov %s1756_s22 }
 0x5af   : > { %p28_p9 = scmp.ge.s32.totalorder %s31_s26, 4   ;;  %s2286_s22 = smov %s1760_s23 }
 0x5b0   : > { %s2287_s23 = smov %s2050_s27  ;;  %s2288_s24 = smov %s1768_s25 }
 0x5b1   : > { %s2289_s25 = smov %s2291_s14  ;;  %30 = sbr.rel (!%p28_p9) target bundleno = 17 (0x11), region = 137 }
 0x5b8   :  { %1055 = vsyncpa [#allocation3], 1 }
 0x5b9   :  { %1057 = vsyncpa [#allocation3 + $0x1], 1 }
 0x5ba   :  { %1058 = vsyncpa [#allocation6], 1 }
 0x5bb   :  { %1059 = vsyncpa [#allocation9], 1 }
 0x5bc   :  { %1060 = vsyncpa [#allocation12], 1 }
 0x5bd   :  { %1061 = vsyncpa [#allocation4], 1 }
 0x5be   :  { %1063 = vsyncpa [#allocation4 + $0x1], 1 }

</bundles_post_ra>
